<compile_context>
chip_gen: v7x
topology: tpu7x:2x2x1
jax: 0.10.0
libtpu: 0.0.40
codegen_flags: <defaults>
</compile_context>

<pallas_src>
import jax
import jax.numpy as jnp
from jax.experimental import pallas as pl
from jax.experimental.pallas import tpu as pltpu

EPS = 1e-5
LANE = 128


def _round_up(n, m):
    return -(-n // m) * m


def classifier_kernel(x_ref,
                      w6, t6, w1, t1, w2, t2, w3, t3, w4, t4, w5, t5,
                      wo, bo,
                      o_ref):
    h = x_ref[...].astype(jnp.bfloat16)
    for w, t in ((w6, t6), (w1, t1), (w2, t2), (w3, t3), (w4, t4), (w5, t5)):
        z = jnp.dot(h, w[...], preferred_element_type=jnp.float32)
        h = jnp.maximum(z + t[...], 0.0).astype(jnp.bfloat16)  # folded BN shift + ReLU
    o_ref[...] = (jnp.dot(h, wo[...], preferred_element_type=jnp.float32)
                  + bo[...]).astype(o_ref.dtype)


def make_params(key, in_features, out_features):
    """Returns (kernel_params, reference_params).

    kernel_params: per-layer (bf16 weight with BN scale folded, f32 shift),
    zero-padded so every output width is a multiple of 128 lanes.
    reference_params: same numerics, unpadded (for the pure-JAX reference).
    """
    dims = [in_features, 1024, 512, 256, 128, 64, 32]
    kernel_layers, ref_layers = [], []
    prev_pad = in_features  # x arrives unpadded; first weight keeps its row count
    for i in range(6):
        d_in, d_out = dims[i], dims[i + 1]
        d_out_pad = _round_up(d_out, LANE)
        key, kw, kb = jax.random.split(key, 3)
        bound = 1.0 / jnp.sqrt(jnp.float32(d_in))
        w = jax.random.uniform(kw, (d_in, d_out), jnp.float32, -bound, bound)
        b = jax.random.uniform(kb, (d_out,), jnp.float32, -bound, bound)
        # deterministic BatchNorm1d (eval) parameters
        gamma = 1.0 + 0.01 * jnp.arange(d_out, dtype=jnp.float32)
        beta = 0.005 * jnp.arange(d_out, dtype=jnp.float32)
        r_mean = 0.02 * jnp.sin(jnp.arange(d_out, dtype=jnp.float32))
        r_var = 1.0 + 0.1 * jnp.cos(jnp.arange(d_out, dtype=jnp.float32)) ** 2
        scale = gamma / jnp.sqrt(r_var + EPS)
        w_folded = w * scale[None, :]                                   # BN scale folded
        shift = ((b - r_mean) * scale + beta).reshape(1, d_out)         # f32 per-feature add
        ref_layers.append((w_folded.astype(jnp.bfloat16), shift))
        # lane-dense padded copies for the kernel (padding is exactly zero)
        w_pad = jnp.zeros((prev_pad, d_out_pad), jnp.float32)
        w_pad = w_pad.at[:d_in, :d_out].set(w_folded)
        t_pad = jnp.zeros((1, d_out_pad), jnp.float32).at[:, :d_out].set(shift)
        kernel_layers.append((w_pad.astype(jnp.bfloat16), t_pad))
        prev_pad = d_out_pad

    key, kw, kb = jax.random.split(key, 3)
    bound = 1.0 / jnp.sqrt(jnp.float32(32))
    wo = jax.random.uniform(kw, (32, out_features), jnp.float32, -bound, bound)
    bo = jax.random.uniform(kb, (out_features,), jnp.float32, -bound, bound)
    out_pad = _round_up(max(out_features, LANE), LANE)
    wo_pad = jnp.zeros((prev_pad, out_pad), jnp.float32)
    wo_pad = wo_pad.at[:32, :out_features].set(wo)
    bo_pad = jnp.zeros((1, out_pad), jnp.float32).at[:, :out_features].set(bo)

    kernel_params = (kernel_layers, wo_pad.astype(jnp.bfloat16), bo_pad)
    ref_params = (ref_layers, wo.astype(jnp.bfloat16), bo.reshape(1, out_features))
    return kernel_params, ref_params


def classifier_forward(x, layers, wo, bo, out_features):
    B, F = x.shape
    out_pad = wo.shape[1]

    # MXU/layout-aware batch tile: 256 is a multiple of 128 (v5e MXU),
    # 256 (v6e/v7x MXU) and 16 (bf16 sublane packing); B >= 512 gives >= 2
    # grid steps so "parallel" can shard across v7x's 2 TensorCores.
    TM = B if B <= 256 else 256
    n_tiles = pl.cdiv(B, TM)

    flat_args = [x]
    in_specs = [pl.BlockSpec((TM, F), lambda i: (i, 0))]
    # Resident params: constant index_map + single buffer (no double-buffer waste).
    for w, t in layers:
        flat_args += [w, t]
        in_specs += [
            pl.BlockSpec(w.shape, lambda i: (0, 0), pipeline_mode=pl.Buffered(1)),
            pl.BlockSpec(t.shape, lambda i: (0, 0), pipeline_mode=pl.Buffered(1)),
        ]
    flat_args += [wo, bo]
    in_specs += [
        pl.BlockSpec(wo.shape, lambda i: (0, 0), pipeline_mode=pl.Buffered(1)),
        pl.BlockSpec(bo.shape, lambda i: (0, 0), pipeline_mode=pl.Buffered(1)),
    ]

    # Advisory cost estimate so XLA schedules around this call sensibly.
    flops = 0
    bytes_accessed = x.size * x.dtype.itemsize + B * out_pad * 4
    for w, t in layers:
        flops += 2 * B * w.shape[0] * w.shape[1]
        bytes_accessed += w.size * w.dtype.itemsize + t.size * t.dtype.itemsize
    flops += 2 * B * wo.shape[0] * wo.shape[1]
    bytes_accessed += wo.size * wo.dtype.itemsize + bo.size * bo.dtype.itemsize

    out_full = pl.pallas_call(
        classifier_kernel,
        out_shape=jax.ShapeDtypeStruct((B, out_pad), jnp.float32),
        grid=(n_tiles,),
        in_specs=in_specs,
        out_specs=pl.BlockSpec((TM, out_pad), lambda i: (i, 0)),
        compiler_params=pltpu.CompilerParams(
            dimension_semantics=("parallel",),
            vmem_limit_bytes=32 << 20,
        ),
        cost_estimate=pl.CostEstimate(
            flops=flops, transcendentals=0, bytes_accessed=bytes_accessed),
    )(*flat_args)

    return out_full[:, :out_features]   # drop the zero lane-padding columns


def classifier_reference(x, layers, wo, bo):
    """Pure-JAX mirror of the kernel numerics (bf16 weights, f32 accumulate), unpadded."""
    h = x.astype(jnp.bfloat16)
    for w, t in layers:
        z = jnp.dot(h, w, preferred_element_type=jnp.float32)
        h = jnp.maximum(z + t, 0.0).astype(jnp.bfloat16)
    return jnp.dot(h, wo, preferred_element_type=jnp.float32) + bo


if __name__ == "__main__":
    key = jax.random.PRNGKey(0)
    in_features, out_features, batch = 128, 16, 8

    kx, kp = jax.random.split(key)
    x = jax.random.normal(kx, (batch, in_features), jnp.float32)
    (k_layers, k_wo, k_bo), (r_layers, r_wo, r_bo) = make_params(
        kp, in_features, out_features)

    out = classifier_forward(x, k_layers, k_wo, k_bo, out_features)
    out = jax.block_until_ready(out)

    ref = classifier_reference(x, r_layers, r_wo, r_bo)
    assert out.shape == (batch, out_features)
    assert jnp.allclose(out, ref, atol=2e-3, rtol=2e-3), "mismatch vs reference"

    print("KERNEL_OK")
</pallas_src>

<mosaic_0001>
module attributes {stable_mosaic.version = 11 : i64} {
  func.func @classifier_kernel(%arg0: i32, %arg1: memref<8x128xf32, #tpu.memory_space<vmem>>, %arg2: memref<128x1024xbf16, #tpu.memory_space<vmem>>, %arg3: memref<1x1024xf32, #tpu.memory_space<vmem>>, %arg4: memref<1024x512xbf16, #tpu.memory_space<vmem>>, %arg5: memref<1x512xf32, #tpu.memory_space<vmem>>, %arg6: memref<512x256xbf16, #tpu.memory_space<vmem>>, %arg7: memref<1x256xf32, #tpu.memory_space<vmem>>, %arg8: memref<256x128xbf16, #tpu.memory_space<vmem>>, %arg9: memref<1x128xf32, #tpu.memory_space<vmem>>, %arg10: memref<128x128xbf16, #tpu.memory_space<vmem>>, %arg11: memref<1x128xf32, #tpu.memory_space<vmem>>, %arg12: memref<128x128xbf16, #tpu.memory_space<vmem>>, %arg13: memref<1x128xf32, #tpu.memory_space<vmem>>, %arg14: memref<128x128xbf16, #tpu.memory_space<vmem>>, %arg15: memref<1x128xf32, #tpu.memory_space<vmem>>, %arg16: memref<8x128xf32, #tpu.memory_space<vmem>>) attributes {dimension_semantics = [#tpu.dimension_semantics<parallel>], iteration_bounds = array<i64: 1>, scalar_prefetch = 0 : i64, scratch_operands = 0 : i64, tpu.core_type = #tpu.core_type<tc>, window_params = [{transform_indices = @transform_0, window_bounds = array<i64: 8, 128>}, {pipeline_mode = #tpu.pipeline_mode<synchronous>, transform_indices = @transform_1, window_bounds = array<i64: 128, 1024>}, {pipeline_mode = #tpu.pipeline_mode<synchronous>, transform_indices = @transform_2, window_bounds = array<i64: 1, 1024>}, {pipeline_mode = #tpu.pipeline_mode<synchronous>, transform_indices = @transform_3, window_bounds = array<i64: 1024, 512>}, {pipeline_mode = #tpu.pipeline_mode<synchronous>, transform_indices = @transform_4, window_bounds = array<i64: 1, 512>}, {pipeline_mode = #tpu.pipeline_mode<synchronous>, transform_indices = @transform_5, window_bounds = array<i64: 512, 256>}, {pipeline_mode = #tpu.pipeline_mode<synchronous>, transform_indices = @transform_6, window_bounds = array<i64: 1, 256>}, {pipeline_mode = #tpu.pipeline_mode<synchronous>, transform_indices = @transform_7, window_bounds = array<i64: 256, 128>}, {pipeline_mode = #tpu.pipeline_mode<synchronous>, transform_indices = @transform_8, window_bounds = array<i64: 1, 128>}, {pipeline_mode = #tpu.pipeline_mode<synchronous>, transform_indices = @transform_9, window_bounds = array<i64: 128, 128>}, {pipeline_mode = #tpu.pipeline_mode<synchronous>, transform_indices = @transform_10, window_bounds = array<i64: 1, 128>}, {pipeline_mode = #tpu.pipeline_mode<synchronous>, transform_indices = @transform_11, window_bounds = array<i64: 128, 128>}, {pipeline_mode = #tpu.pipeline_mode<synchronous>, transform_indices = @transform_12, window_bounds = array<i64: 1, 128>}, {pipeline_mode = #tpu.pipeline_mode<synchronous>, transform_indices = @transform_13, window_bounds = array<i64: 128, 128>}, {pipeline_mode = #tpu.pipeline_mode<synchronous>, transform_indices = @transform_14, window_bounds = array<i64: 1, 128>}, {transform_indices = @transform_15, window_bounds = array<i64: 8, 128>}]} {
    %c0 = arith.constant 0 : index
    %c0_0 = arith.constant 0 : index
    %0 = vector.load %arg1[%c0, %c0_0] : memref<8x128xf32, #tpu.memory_space<vmem>>, vector<8x128xf32>
    %1 = arith.truncf %0 : vector<8x128xf32> to vector<8x128xbf16>
    %c0_1 = arith.constant 0 : index
    %c0_2 = arith.constant 0 : index
    %2 = vector.load %arg2[%c0_1, %c0_2] : memref<128x1024xbf16, #tpu.memory_space<vmem>>, vector<128x1024xbf16>
    %cst = arith.constant dense<0.000000e+00> : vector<8x1024xf32>
    %3 = tpu.matmul %1, %2, %cst {dimension_numbers = #tpu.dot_dimension_numbers<[1], [0], [0], [1], [0, 0, 1, 1], [], []>} : vector<8x128xbf16>, vector<128x1024xbf16>, vector<8x1024xf32> -> vector<8x1024xf32>
    %c0_3 = arith.constant 0 : index
    %c0_4 = arith.constant 0 : index
    %4 = vector.load %arg3[%c0_3, %c0_4] : memref<1x1024xf32, #tpu.memory_space<vmem>>, vector<1x1024xf32>
    %5 = vector.broadcast %4 : vector<1x1024xf32> to vector<8x1024xf32>
    %6 = arith.addf %3, %5 : vector<8x1024xf32>
    %cst_5 = arith.constant 0.000000e+00 : f32
    %7 = vector.broadcast %cst_5 : f32 to vector<8x1024xf32>
    %8 = arith.maximumf %6, %7 : vector<8x1024xf32>
    %9 = arith.truncf %8 : vector<8x1024xf32> to vector<8x1024xbf16>
    %c0_6 = arith.constant 0 : index
    %c0_7 = arith.constant 0 : index
    %10 = vector.load %arg4[%c0_6, %c0_7] : memref<1024x512xbf16, #tpu.memory_space<vmem>>, vector<1024x512xbf16>
    %cst_8 = arith.constant dense<0.000000e+00> : vector<8x512xf32>
    %11 = tpu.matmul %9, %10, %cst_8 {dimension_numbers = #tpu.dot_dimension_numbers<[1], [0], [0], [1], [0, 0, 1, 1], [], []>} : vector<8x1024xbf16>, vector<1024x512xbf16>, vector<8x512xf32> -> vector<8x512xf32>
    %c0_9 = arith.constant 0 : index
    %c0_10 = arith.constant 0 : index
    %12 = vector.load %arg5[%c0_9, %c0_10] : memref<1x512xf32, #tpu.memory_space<vmem>>, vector<1x512xf32>
    %13 = vector.broadcast %12 : vector<1x512xf32> to vector<8x512xf32>
    %14 = arith.addf %11, %13 : vector<8x512xf32>
    %cst_11 = arith.constant 0.000000e+00 : f32
    %15 = vector.broadcast %cst_11 : f32 to vector<8x512xf32>
    %16 = arith.maximumf %14, %15 : vector<8x512xf32>
    %17 = arith.truncf %16 : vector<8x512xf32> to vector<8x512xbf16>
    %c0_12 = arith.constant 0 : index
    %c0_13 = arith.constant 0 : index
    %18 = vector.load %arg6[%c0_12, %c0_13] : memref<512x256xbf16, #tpu.memory_space<vmem>>, vector<512x256xbf16>
    %cst_14 = arith.constant dense<0.000000e+00> : vector<8x256xf32>
    %19 = tpu.matmul %17, %18, %cst_14 {dimension_numbers = #tpu.dot_dimension_numbers<[1], [0], [0], [1], [0, 0, 1, 1], [], []>} : vector<8x512xbf16>, vector<512x256xbf16>, vector<8x256xf32> -> vector<8x256xf32>
    %c0_15 = arith.constant 0 : index
    %c0_16 = arith.constant 0 : index
    %20 = vector.load %arg7[%c0_15, %c0_16] : memref<1x256xf32, #tpu.memory_space<vmem>>, vector<1x256xf32>
    %21 = vector.broadcast %20 : vector<1x256xf32> to vector<8x256xf32>
    %22 = arith.addf %19, %21 : vector<8x256xf32>
    %cst_17 = arith.constant 0.000000e+00 : f32
    %23 = vector.broadcast %cst_17 : f32 to vector<8x256xf32>
    %24 = arith.maximumf %22, %23 : vector<8x256xf32>
    %25 = arith.truncf %24 : vector<8x256xf32> to vector<8x256xbf16>
    %c0_18 = arith.constant 0 : index
    %c0_19 = arith.constant 0 : index
    %26 = vector.load %arg8[%c0_18, %c0_19] : memref<256x128xbf16, #tpu.memory_space<vmem>>, vector<256x128xbf16>
    %cst_20 = arith.constant dense<0.000000e+00> : vector<8x128xf32>
    %27 = tpu.matmul %25, %26, %cst_20 {dimension_numbers = #tpu.dot_dimension_numbers<[1], [0], [0], [1], [0, 0, 1, 1], [], []>} : vector<8x256xbf16>, vector<256x128xbf16>, vector<8x128xf32> -> vector<8x128xf32>
    %c0_21 = arith.constant 0 : index
    %c0_22 = arith.constant 0 : index
    %28 = vector.load %arg9[%c0_21, %c0_22] : memref<1x128xf32, #tpu.memory_space<vmem>>, vector<1x128xf32>
    %29 = vector.broadcast %28 : vector<1x128xf32> to vector<8x128xf32>
    %30 = arith.addf %27, %29 : vector<8x128xf32>
    %cst_23 = arith.constant 0.000000e+00 : f32
    %31 = vector.broadcast %cst_23 : f32 to vector<8x128xf32>
    %32 = arith.maximumf %30, %31 : vector<8x128xf32>
    %33 = arith.truncf %32 : vector<8x128xf32> to vector<8x128xbf16>
    %c0_24 = arith.constant 0 : index
    %c0_25 = arith.constant 0 : index
    %34 = vector.load %arg10[%c0_24, %c0_25] : memref<128x128xbf16, #tpu.memory_space<vmem>>, vector<128x128xbf16>
    %cst_26 = arith.constant dense<0.000000e+00> : vector<8x128xf32>
    %35 = tpu.matmul %33, %34, %cst_26 {dimension_numbers = #tpu.dot_dimension_numbers<[1], [0], [0], [1], [0, 0, 1, 1], [], []>} : vector<8x128xbf16>, vector<128x128xbf16>, vector<8x128xf32> -> vector<8x128xf32>
    %c0_27 = arith.constant 0 : index
    %c0_28 = arith.constant 0 : index
    %36 = vector.load %arg11[%c0_27, %c0_28] : memref<1x128xf32, #tpu.memory_space<vmem>>, vector<1x128xf32>
    %37 = vector.broadcast %36 : vector<1x128xf32> to vector<8x128xf32>
    %38 = arith.addf %35, %37 : vector<8x128xf32>
    %cst_29 = arith.constant 0.000000e+00 : f32
    %39 = vector.broadcast %cst_29 : f32 to vector<8x128xf32>
    %40 = arith.maximumf %38, %39 : vector<8x128xf32>
    %41 = arith.truncf %40 : vector<8x128xf32> to vector<8x128xbf16>
    %c0_30 = arith.constant 0 : index
    %c0_31 = arith.constant 0 : index
    %42 = vector.load %arg12[%c0_30, %c0_31] : memref<128x128xbf16, #tpu.memory_space<vmem>>, vector<128x128xbf16>
    %cst_32 = arith.constant dense<0.000000e+00> : vector<8x128xf32>
    %43 = tpu.matmul %41, %42, %cst_32 {dimension_numbers = #tpu.dot_dimension_numbers<[1], [0], [0], [1], [0, 0, 1, 1], [], []>} : vector<8x128xbf16>, vector<128x128xbf16>, vector<8x128xf32> -> vector<8x128xf32>
    %c0_33 = arith.constant 0 : index
    %c0_34 = arith.constant 0 : index
    %44 = vector.load %arg13[%c0_33, %c0_34] : memref<1x128xf32, #tpu.memory_space<vmem>>, vector<1x128xf32>
    %45 = vector.broadcast %44 : vector<1x128xf32> to vector<8x128xf32>
    %46 = arith.addf %43, %45 : vector<8x128xf32>
    %cst_35 = arith.constant 0.000000e+00 : f32
    %47 = vector.broadcast %cst_35 : f32 to vector<8x128xf32>
    %48 = arith.maximumf %46, %47 : vector<8x128xf32>
    %49 = arith.truncf %48 : vector<8x128xf32> to vector<8x128xbf16>
    %c0_36 = arith.constant 0 : index
    %c0_37 = arith.constant 0 : index
    %50 = vector.load %arg14[%c0_36, %c0_37] : memref<128x128xbf16, #tpu.memory_space<vmem>>, vector<128x128xbf16>
    %cst_38 = arith.constant dense<0.000000e+00> : vector<8x128xf32>
    %51 = tpu.matmul %49, %50, %cst_38 {dimension_numbers = #tpu.dot_dimension_numbers<[1], [0], [0], [1], [0, 0, 1, 1], [], []>} : vector<8x128xbf16>, vector<128x128xbf16>, vector<8x128xf32> -> vector<8x128xf32>
    %c0_39 = arith.constant 0 : index
    %c0_40 = arith.constant 0 : index
    %52 = vector.load %arg15[%c0_39, %c0_40] : memref<1x128xf32, #tpu.memory_space<vmem>>, vector<1x128xf32>
    %53 = vector.broadcast %52 : vector<1x128xf32> to vector<8x128xf32>
    %54 = arith.addf %51, %53 : vector<8x128xf32>
    %c0_41 = arith.constant 0 : index
    %c0_42 = arith.constant 0 : index
    %55 = vector.load %arg16[%c0_41, %c0_42] : memref<8x128xf32, #tpu.memory_space<vmem>>, vector<8x128xf32>
    tpu.vector_store %arg16[%c0_41, %c0_42], %54 {strides = array<i32>} : memref<8x128xf32, #tpu.memory_space<vmem>>, vector<8x128xf32>,
    return
  }
  func.func @transform_0(%arg0: i32) -> (i32, i32) {
    %c0_i32 = arith.constant 0 : i32
    %c0_i32_0 = arith.constant 0 : i32
    return %arg0, %c0_i32 : i32, i32
  }
  func.func @transform_1(%arg0: i32) -> (i32, i32) {
    %c0_i32 = arith.constant 0 : i32
    %c0_i32_0 = arith.constant 0 : i32
    %c0_i32_1 = arith.constant 0 : i32
    return %c0_i32, %c0_i32_0 : i32, i32
  }
  func.func @transform_2(%arg0: i32) -> (i32, i32) {
    %c0_i32 = arith.constant 0 : i32
    %c0_i32_0 = arith.constant 0 : i32
    %c0_i32_1 = arith.constant 0 : i32
    return %c0_i32, %c0_i32_0 : i32, i32
  }
  func.func @transform_3(%arg0: i32) -> (i32, i32) {
    %c0_i32 = arith.constant 0 : i32
    %c0_i32_0 = arith.constant 0 : i32
    %c0_i32_1 = arith.constant 0 : i32
    return %c0_i32, %c0_i32_0 : i32, i32
  }
  func.func @transform_4(%arg0: i32) -> (i32, i32) {
    %c0_i32 = arith.constant 0 : i32
    %c0_i32_0 = arith.constant 0 : i32
    %c0_i32_1 = arith.constant 0 : i32
    return %c0_i32, %c0_i32_0 : i32, i32
  }
  func.func @transform_5(%arg0: i32) -> (i32, i32) {
    %c0_i32 = arith.constant 0 : i32
    %c0_i32_0 = arith.constant 0 : i32
    %c0_i32_1 = arith.constant 0 : i32
    return %c0_i32, %c0_i32_0 : i32, i32
  }
  func.func @transform_6(%arg0: i32) -> (i32, i32) {
    %c0_i32 = arith.constant 0 : i32
    %c0_i32_0 = arith.constant 0 : i32
    %c0_i32_1 = arith.constant 0 : i32
    return %c0_i32, %c0_i32_0 : i32, i32
  }
  func.func @transform_7(%arg0: i32) -> (i32, i32) {
    %c0_i32 = arith.constant 0 : i32
    %c0_i32_0 = arith.constant 0 : i32
    %c0_i32_1 = arith.constant 0 : i32
    return %c0_i32, %c0_i32_0 : i32, i32
  }
  func.func @transform_8(%arg0: i32) -> (i32, i32) {
    %c0_i32 = arith.constant 0 : i32
    %c0_i32_0 = arith.constant 0 : i32
    %c0_i32_1 = arith.constant 0 : i32
    return %c0_i32, %c0_i32_0 : i32, i32
  }
  func.func @transform_9(%arg0: i32) -> (i32, i32) {
    %c0_i32 = arith.constant 0 : i32
    %c0_i32_0 = arith.constant 0 : i32
    %c0_i32_1 = arith.constant 0 : i32
    return %c0_i32, %c0_i32_0 : i32, i32
  }
  func.func @transform_10(%arg0: i32) -> (i32, i32) {
    %c0_i32 = arith.constant 0 : i32
    %c0_i32_0 = arith.constant 0 : i32
    %c0_i32_1 = arith.constant 0 : i32
    return %c0_i32, %c0_i32_0 : i32, i32
  }
  func.func @transform_11(%arg0: i32) -> (i32, i32) {
    %c0_i32 = arith.constant 0 : i32
    %c0_i32_0 = arith.constant 0 : i32
    %c0_i32_1 = arith.constant 0 : i32
    return %c0_i32, %c0_i32_0 : i32, i32
  }
  func.func @transform_12(%arg0: i32) -> (i32, i32) {
    %c0_i32 = arith.constant 0 : i32
    %c0_i32_0 = arith.constant 0 : i32
    %c0_i32_1 = arith.constant 0 : i32
    return %c0_i32, %c0_i32_0 : i32, i32
  }
  func.func @transform_13(%arg0: i32) -> (i32, i32) {
    %c0_i32 = arith.constant 0 : i32
    %c0_i32_0 = arith.constant 0 : i32
    %c0_i32_1 = arith.constant 0 : i32
    return %c0_i32, %c0_i32_0 : i32, i32
  }
  func.func @transform_14(%arg0: i32) -> (i32, i32) {
    %c0_i32 = arith.constant 0 : i32
    %c0_i32_0 = arith.constant 0 : i32
    %c0_i32_1 = arith.constant 0 : i32
    return %c0_i32, %c0_i32_0 : i32, i32
  }
  func.func @transform_15(%arg0: i32) -> (i32, i32) {
    %c0_i32 = arith.constant 0 : i32
    %c0_i32_0 = arith.constant 0 : i32
    return %arg0, %c0_i32 : i32, i32
  }
}

</mosaic_0001>

<bundles_post_ra>
// kernel: tpu_custom_call.1
= control target key start
LH: loop header
LB: loop body
LE: loop exit
PB: predicated region body
PF: predicated region fallthrough
CT: control target
= control target key end

     0   :  { %20 = vsyncpa [#allocation3], 0  ;;  %s5385_s0 = inlined_call_operand.hbm [shape: f32[8,128], index: 0, kind: input, shape index: {}]   ;;  %s5386_s1 = inlined_call_operand.hbm [shape: bf16[128,1024], index: 1, kind: input, shape index: {}]   ;;  %s5387_s2 = inlined_call_operand.hbm [shape: f32[1,1024], index: 2, kind: input, shape index: {}]   ;;  %s5388_s3 = inlined_call_operand.hbm [shape: bf16[1024,512], index: 3, kind: input, shape index: {}]   ;;  %s5389_s4 = inlined_call_operand.vmem [shape: f32[1,512], index: 4, kind: input, shape index: {}]   ;;  %s5390_s5 = inlined_call_operand.hbm [shape: bf16[512,256], index: 5, kind: input, shape index: {}]   ;;  %s5391_s6 = inlined_call_operand.vmem [shape: f32[1,256], index: 6, kind: input, shape index: {}]   ;;  %s5392_s7 = inlined_call_operand.hbm [shape: bf16[256,128], index: 7, kind: input, shape index: {}]   ;;  %s5393_s8 = inlined_call_operand.vmem [shape: f32[1,128], index: 8, kind: input, shape index: {}]   ;;  %s5394_s9 = inlined_call_operand.hbm [shape: bf16[128,128], index: 9, kind: input, shape index: {}]   ;;  %s5395_s10 = inlined_call_operand.vmem [shape: f32[1,128], index: 10, kind: input, shape index: {}]   ;;  %s5396_s11 = inlined_call_operand.hbm [shape: bf16[128,128], index: 11, kind: input, shape index: {}]   ;;  %s5397_s12 = inlined_call_operand.vmem [shape: f32[1,128], index: 12, kind: input, shape index: {}]   ;;  %s5398_s13 = inlined_call_operand.hbm [shape: bf16[128,128], index: 13, kind: input, shape index: {}]   ;;  %s5399_s14 = inlined_call_operand.vmem [shape: f32[1,128], index: 14, kind: input, shape index: {}]   ;;  %s5400_s15 = inlined_call_operand.hbm [shape: f32[8,128], index: 15, kind: output, shape index: {}]  }
   0x1   :  { %21 = vsyncpa [#allocation6], 0 }
   0x2   :  { %22 = vsyncpa [#allocation9], 0 }
   0x3   :  { %23 = vsyncpa [#allocation12], 0 }
   0x4   :  { %24 = vsyncpa [#allocation15], 0 }
   0x5   :  { %25 = vsyncpa [#allocation4], 0  ;;  %s5032_s18 = smov [#allocation5]   ;;  %s4800_s22 = scalar_lea.hbm %s5386_s1, 8192 }
   0x6   :  { %s41_s19 = sshll.u32 %s5032_s18, 4  ;;  %p4801_p0 = scmp.ne.s32.totalorder %s5386_s1, %s4800_s22  ;;  %s42_s19 = int_to_ptr.vmem [resolvable:$true] %s41_s19 }
   0x7   :  { %p4804_p1 = scmp.lt.u32.totalorder %s4800_s22, %s5386_s1 }
   0x9   :  { %p4806_p2 = pnand %p4804_p1, %p4801_p0 }
   0xb   :  { %4809 = shalt.err (!%p4806_p2)
}
   0xc   :  { %s4810_s27 = scalar_lea.vmem %s42_s19, 8192  ;;  %p4815_p4 = scmp.lt.s32.totalorder %s42_s19, %s42_s19 }
   0xd   :  { %p4811_p3 = scmp.ne.s32.totalorder %s42_s19, %s4810_s27  ;;  %p4816_p5 = scmp.lt.s32.totalorder %s4810_s27, %s4810_s27 }
   0xf   :  { %p4817_p6 = por %p4816_p5, %p4815_p4 }
  0x11   :  { %p4818_p7 = pnand %p4817_p6, %p4811_p3 }
  0x13   :  { %4821 = shalt.err (!%p4818_p7)
}
  0x14   :  { %s5033_s28 = smov 512   ;;  %s5034_s29 = smov 32  }
  0x15   :  { %47 = dma.hbm_to_vmem [thread:$0]  %s5386_s1, 8192, %s42_s19, [#allocation6], %s5033_s28, %s5033_s28, %s5034_s29  }
  0x16   :  { %s5035_s17 = smov [#allocation8]   ;;  %s4822_s22 = scalar_lea.hbm %s5388_s3, 32768 }
  0x17   :  { %s63_s18 = sshll.u32 %s5035_s17, 4  ;;  %p4823_p8 = scmp.ne.s32.totalorder %s5388_s3, %s4822_s22  ;;  %s64_s18 = int_to_ptr.vmem [resolvable:$true] %s63_s18 }
  0x18   :  { %p4826_p9 = scmp.lt.u32.totalorder %s4822_s22, %s5388_s3 }
  0x1a   :  { %p4828_p10 = pnand %p4826_p9, %p4823_p8 }
  0x1c   :  { %4831 = shalt.err (!%p4828_p10)
}
  0x1d   :  { %s4832_s27 = scalar_lea.vmem %s64_s18, 32768  ;;  %p4837_p12 = scmp.lt.s32.totalorder %s64_s18, %s64_s18 }
  0x1e   :  { %p4833_p11 = scmp.ne.s32.totalorder %s64_s18, %s4832_s27  ;;  %p4838_p13 = scmp.lt.s32.totalorder %s4832_s27, %s4832_s27 }
  0x20   :  { %p4839_p0 = por %p4838_p13, %p4837_p12 }
  0x22   :  { %p4840_p1 = pnand %p4839_p0, %p4833_p11 }
  0x24   :  { %4843 = shalt.err (!%p4840_p1)
}
  0x25   :  { %s5036_s1 = smov 256   ;;  %s5037_s19 = smov 16  }
  0x26   :  { %69 = dma.hbm_to_vmem [thread:$0]  %s5388_s3, 32768, %s64_s18, [#allocation9], %s5036_s1, %s5036_s1, %s5037_s19  }
  0x27   :  { %s5038_s30 = smov [#allocation11]   ;;  %s4844_s21 = scalar_lea.hbm %s5392_s7, 2048 }
  0x28   :  { %s91_s16 = sshll.u32 %s5038_s30, 4  ;;  %p4845_p2 = scmp.ne.s32.totalorder %s5392_s7, %s4844_s21  ;;  %s92_s16 = int_to_ptr.vmem [resolvable:$true] %s91_s16 }
  0x29   :  { %p4848_p3 = scmp.lt.u32.totalorder %s4844_s21, %s5392_s7 }
  0x2b   :  { %p4850_p4 = pnand %p4848_p3, %p4845_p2 }
  0x2d   :  { %4853 = shalt.err (!%p4850_p4)
}
  0x2e   :  { %s4854_s26 = scalar_lea.vmem %s92_s16, 2048  ;;  %p4859_p6 = scmp.lt.s32.totalorder %s92_s16, %s92_s16 }
  0x2f   :  { %p4855_p5 = scmp.ne.s32.totalorder %s92_s16, %s4854_s26  ;;  %p4860_p7 = scmp.lt.s32.totalorder %s4854_s26, %s4854_s26 }
  0x31   :  { %p4861_p8 = por %p4860_p7, %p4859_p6 }
  0x33   :  { %p4862_p9 = pnand %p4861_p8, %p4855_p5 }
  0x35   :  { %4865 = shalt.err (!%p4862_p9)
}
  0x36   :  { %s5039_s3 = smov 64   ;;  %s5040_s18 = smov 4  }
  0x37   :  { %97 = dma.hbm_to_vmem [thread:$0]  %s5392_s7, 2048, %s92_s16, [#allocation12], %s5039_s3, %s5039_s3, %s5040_s18  }
  0x38   :  { %s5041_s19 = smov [#allocation14]   ;;  %s5042_s29 = smov [#allocation2]  }
  0x39   :  { %s119_s28 = sshll.u32 %s5041_s19, 4  ;;  %s32_s30 = sshll.u32 %s5042_s29, 4  ;;  %s120_s28 = int_to_ptr.vmem [resolvable:$true] %s119_s28  ;;  %s33_s30 = int_to_ptr.vmem [resolvable:$true] %s32_s30 }
  0x3a   :  { %s4866_s21 = scalar_lea.hbm %s5396_s11, 1024 }
  0x3b   :  { %p4867_p10 = scmp.ne.s32.totalorder %s5396_s11, %s4866_s21  ;;  %p4870_p11 = scmp.lt.u32.totalorder %s4866_s21, %s5396_s11 }
  0x3d   :  { %p4872_p12 = pnand %p4870_p11, %p4867_p10 }
  0x3f   :  { %4875 = shalt.err (!%p4872_p12)
}
  0x40   :  { %s4876_s7 = scalar_lea.vmem %s120_s28, 1024  ;;  %p4881_p0 = scmp.lt.s32.totalorder %s120_s28, %s120_s28 }
  0x41   :  { %p4877_p13 = scmp.ne.s32.totalorder %s120_s28, %s4876_s7  ;;  %p4882_p1 = scmp.lt.s32.totalorder %s4876_s7, %s4876_s7 }
  0x43   :  { %p4883_p2 = por %p4882_p1, %p4881_p0 }
  0x45   :  { %p4884_p3 = pnand %p4883_p2, %p4877_p13 }
  0x47   :  { %4887 = shalt.err (!%p4884_p3)
}
  0x48   :  { %125 = dma.hbm_to_vmem [thread:$0]  %s5396_s11, 1024, %s120_s28, [#allocation15], %s5039_s3, %s5039_s3, %s5040_s18  }
  0x49   :  { %s4888_s19 = scalar_lea.hbm %s5385_s0, 128 }
  0x4a   :  { %p4889_p4 = scmp.ne.s32.totalorder %s5385_s0, %s4888_s19  ;;  %p4892_p5 = scmp.lt.u32.totalorder %s4888_s19, %s5385_s0 }
  0x4c   :  { %p4894_p6 = pnand %p4892_p5, %p4889_p4 }
  0x4e   :  { %4897 = shalt.err (!%p4894_p6)
}
  0x4f   :  { %s4898_s22 = scalar_lea.vmem %s33_s30, 128  ;;  %p4903_p8 = scmp.lt.s32.totalorder %s33_s30, %s33_s30 }
  0x50   :  { %p4899_p7 = scmp.ne.s32.totalorder %s33_s30, %s4898_s22  ;;  %p4904_p9 = scmp.lt.s32.totalorder %s4898_s22, %s4898_s22 }
  0x52   :  { %p4905_p10 = por %p4904_p9, %p4903_p8 }
  0x54   :  { %p4906_p11 = pnand %p4905_p10, %p4899_p7 }
  0x56   :  { %4909 = shalt.err (!%p4906_p11)
}
  0x57   :  { %35 = dma.hbm_to_vmem [thread:$0]  %s5385_s0, 128, %s33_s30, [#allocation3]  }
  0x58   :  { %s5043_s23 = smov [#allocation7]   ;;  %s5044_s25 = smov [#allocation10]  }
  0x59   :  { %s54_s24 = sshll.u32 %s5043_s23, 4  ;;  %s77_s7 = sshll.u32 %s5044_s25, 4  ;;  %s55_s24 = int_to_ptr.vmem [resolvable:$true] %s54_s24  ;;  %s78_s7 = int_to_ptr.vmem [resolvable:$true] %s77_s7 }
  0x5a   :  { %s4910_s27 = scalar_lea.hbm %s5387_s2, 128 }
  0x5b   :  { %p4911_p12 = scmp.ne.s32.totalorder %s5387_s2, %s4910_s27  ;;  %p4914_p13 = scmp.lt.u32.totalorder %s4910_s27, %s5387_s2 }
  0x5d   :  { %p4916_p0 = pnand %p4914_p13, %p4911_p12 }
  0x5f   :  { %4919 = shalt.err (!%p4916_p0)
}
  0x60   :  { %s4920_s0 = scalar_lea.vmem %s55_s24, 128  ;;  %p4925_p2 = scmp.lt.s32.totalorder %s55_s24, %s55_s24 }
  0x61   :  { %p4921_p1 = scmp.ne.s32.totalorder %s55_s24, %s4920_s0  ;;  %p4926_p3 = scmp.lt.s32.totalorder %s4920_s0, %s4920_s0 }
  0x63   :  { %p4927_p4 = por %p4926_p3, %p4925_p2 }
  0x65   :  { %p4928_p5 = pnand %p4927_p4, %p4921_p1 }
  0x67   :  { %4931 = shalt.err (!%p4928_p5)
}
  0x68   :  { %57 = dma.hbm_to_vmem [thread:$0]  %s5387_s2, 128, %s55_s24, [#allocation6]  }
  0x69   :  { %s4932_s11 = scalar_lea.hbm %s5390_s5, 8192 }
  0x6a   :  { %p4933_p6 = scmp.ne.s32.totalorder %s5390_s5, %s4932_s11  ;;  %p4936_p7 = scmp.lt.u32.totalorder %s4932_s11, %s5390_s5 }
  0x6c   :  { %p4938_p8 = pnand %p4936_p7, %p4933_p6 }
  0x6e   :  { %4941 = shalt.err (!%p4938_p8)
}
  0x6f   :  { %s4942_s26 = scalar_lea.vmem %s78_s7, 8192  ;;  %p4947_p10 = scmp.lt.s32.totalorder %s78_s7, %s78_s7 }
  0x70   :  { %p4943_p9 = scmp.ne.s32.totalorder %s78_s7, %s4942_s26  ;;  %p4948_p11 = scmp.lt.s32.totalorder %s4942_s26, %s4942_s26 }
  0x72   :  { %p4949_p12 = por %p4948_p11, %p4947_p10 }
  0x74   :  { %p4950_p13 = pnand %p4949_p12, %p4943_p9 }
  0x76   :  { %4953 = shalt.err (!%p4950_p13)
}
  0x77   :  { %s5045_s2 = smov 128   ;;  %s5046_s24 = smov 8  }
  0x78   :  { %83 = dma.hbm_to_vmem [thread:$0]  %s5390_s5, 8192, %s78_s7, [#allocation9], %s5045_s2, %s5045_s2, %s5046_s24  }
  0x79   :  { %s5047_s19 = smov [#allocation13]   ;;  %s5048_s17 = smov [#allocation16]  }
  0x7a   :  { %s105_s29 = sshll.u32 %s5047_s19, 4  ;;  %s133_s0 = sshll.u32 %s5048_s17, 4  ;;  %s106_s29 = int_to_ptr.vmem [resolvable:$true] %s105_s29  ;;  %s134_s0 = int_to_ptr.vmem [resolvable:$true] %s133_s0 }
  0x7b   :  { %s4954_s21 = scalar_lea.hbm %s5394_s9, 1024 }
  0x7c   :  { %p4955_p0 = scmp.ne.s32.totalorder %s5394_s9, %s4954_s21  ;;  %p4958_p1 = scmp.lt.u32.totalorder %s4954_s21, %s5394_s9 }
  0x7e   :  { %p4960_p2 = pnand %p4958_p1, %p4955_p0 }
  0x80   :  { %4963 = shalt.err (!%p4960_p2)
}
  0x81   :  { %s4964_s5 = scalar_lea.vmem %s106_s29, 1024  ;;  %p4969_p4 = scmp.lt.s32.totalorder %s106_s29, %s106_s29 }
  0x82   :  { %p4965_p3 = scmp.ne.s32.totalorder %s106_s29, %s4964_s5  ;;  %p4970_p5 = scmp.lt.s32.totalorder %s4964_s5, %s4964_s5 }
  0x84   :  { %p4971_p6 = por %p4970_p5, %p4969_p4 }
  0x86   :  { %p4972_p7 = pnand %p4971_p6, %p4965_p3 }
  0x88   :  { %4975 = shalt.err (!%p4972_p7)
}
  0x89   :  { %111 = dma.hbm_to_vmem [thread:$0]  %s5394_s9, 1024, %s106_s29, [#allocation12], %s5039_s3, %s5039_s3, %s5040_s18  }
  0x8a   :  { %s4976_s2 = scalar_lea.hbm %s5398_s13, 1024 }
  0x8b   :  { %p4977_p8 = scmp.ne.s32.totalorder %s5398_s13, %s4976_s2  ;;  %p4980_p9 = scmp.lt.u32.totalorder %s4976_s2, %s5398_s13 }
  0x8d   :  { %p4982_p10 = pnand %p4980_p9, %p4977_p8 }
  0x8f   :  { %4985 = shalt.err (!%p4982_p10)
}
  0x90   :  { %s4986_s17 = scalar_lea.vmem %s134_s0, 1024  ;;  %p4991_p12 = scmp.lt.s32.totalorder %s134_s0, %s134_s0 }
  0x91   :  { %p4987_p11 = scmp.ne.s32.totalorder %s134_s0, %s4986_s17  ;;  %p4992_p13 = scmp.lt.s32.totalorder %s4986_s17, %s4986_s17 }
  0x93   :  { %p4993_p0 = por %p4992_p13, %p4991_p12 }
  0x95   :  { %p4994_p1 = pnand %p4993_p0, %p4987_p11 }
  0x97   :  { %4997 = shalt.err (!%p4994_p1)
}
  0x98   :  { %139 = dma.hbm_to_vmem [thread:$0]  %s5398_s13, 1024, %s134_s0, [#allocation15], %s5039_s3, %s5039_s3, %s5040_s18  }
  0x99   :  { %5020 = dma.done.wait [#allocation3], 128  }
  0x9a   :  { %5021 = vsyncadd [#allocation3], 4294967168 }
  0x9b   :  { %5022 = dma.done.wait [#allocation6], 8320  }
  0x9c   :  { %5023 = vsyncadd [#allocation6], 4294958976 }
  0x9d   :  { %5024 = dma.done.wait [#allocation9], 40960  }
  0x9e   :  { %5025 = vsyncadd [#allocation9], 4294926336 }
  0x9f   :  { %5026 = dma.done.wait [#allocation12], 3072  }
  0xa0   :  { %5027 = vsyncadd [#allocation12], 4294964224 }
  0xa1   :  { %5028 = dma.done.wait [#allocation15], 2048  }
  0xa2   :  { %5029 = vsyncadd [#allocation15], 4294965248  ;;  %v5049_v0 = vmov 0   ;;  %v172_v1 = vld [vmem:[#allocation5] sm:$0xff]  ;;  %v173_v14 = vld [vmem:[#allocation5 + $0x8] sm:$0xff]  ;;  %vm5051_vm0 = vmmov 0  }
  0xa3   :  { %630 = vmatprep.mubr.bf16.mxu0 %v5049_v0  ;;  %671 = vmatprep.mubr.bf16.mxu1 %v5049_v0  ;;  %v176_v2 = vld [vmem:[#allocation5 + $0x20] sm:$0xff]  ;;  %v177_v15 = vld [vmem:[#allocation5 + $0x28] sm:$0xff]  ;;  %v170_v57 = vld [vmem:[#allocation2] sm:$0xff]  ;;  %s5052_s11 = smov [#allocation17]  }
  0xa4   :  { %v180_v3 = vld [vmem:[#allocation5 + $0x40] sm:$0xff]  ;;  %v3689_v4 = vcombine.high %v172_v1, %v176_v2  ;;  %v3688_v5 = vcombine.low %v172_v1, %v176_v2  ;;  %v181_v16 = vld [vmem:[#allocation5 + $0x48] sm:$0xff]  ;;  %v3691_v18 = vcombine.high %v173_v14, %v177_v15  ;;  %v3690_v19 = vcombine.low %v173_v14, %v177_v15  ;;  %v174_v59 = vld [vmem:[#allocation5 + $0x10] sm:$0xff]  ;;  %s3675_s28 = sshll.u32 %s5052_s11, 4  ;;  %s3676_s28 = int_to_ptr.vmem [resolvable:$true] %s3675_s28 }
  0xa5   :  { %v184_v6 = vld [vmem:[#allocation5 + $0x60] sm:$0xff]  ;;  %v185_v17 = vld [vmem:[#allocation5 + $0x68] sm:$0xff]  ;;  %v178_v60 = vld [vmem:[#allocation5 + $0x30] sm:$0xff]  ;;  %p5003_p3 = scmp.lt.s32.totalorder %s3676_s28, %s3676_s28 }
  0xa6   :  { %v3697_v7 = vcombine.high %v180_v3, %v184_v6  ;;  %v188_v8 = vld [vmem:[#allocation5 + $0x80] sm:$0xff]  ;;  %598 = vmatprep.subr.bf16.mxu0 %v3689_v4  ;;  %v3696_v10 = vcombine.low %v180_v3, %v184_v6  ;;  %v3699_v20 = vcombine.high %v181_v16, %v185_v17  ;;  %v189_v22 = vld [vmem:[#allocation5 + $0x88] sm:$0xff]  ;;  %639 = vmatprep.subr.bf16.mxu1 %v3691_v18  ;;  %v182_v4 = vld [vmem:[#allocation5 + $0x50] sm:$0xff] }
  0xa7   :  { %v192_v9 = vld [vmem:[#allocation5 + $0xa0] sm:$0xff]  ;;  %599 = vmatpush1.bf16.msra.mxu0 %v3688_v5  ;;  %v193_v23 = vld [vmem:[#allocation5 + $0xa8] sm:$0xff]  ;;  %640 = vmatpush1.bf16.msra.mxu1 %v3690_v19  ;;  %v3698_v27 = vcombine.low %v181_v16, %v185_v17  ;;  %v3693_v2 = vcombine.high %v174_v59, %v178_v60  ;;  %v186_v5 = vld [vmem:[#allocation5 + $0x70] sm:$0xff]  ;;  %v5255_v6 = vpack.c.bf16 %v170_v57, %v170_v57 }
  0xa8   :  { %600 = vmatprep.subr.bf16.mxu0 %v3697_v7  ;;  %v3705_v11 = vcombine.high %v188_v8, %v192_v9  ;;  %v196_v12 = vld [vmem:[#allocation5 + $0xc0] sm:$0xff]  ;;  %v3704_v21 = vcombine.low %v188_v8, %v192_v9  ;;  %641 = vmatprep.subr.bf16.mxu1 %v3699_v20  ;;  %v3707_v28 = vcombine.high %v189_v22, %v193_v23  ;;  %v197_v30 = vld [vmem:[#allocation5 + $0xc8] sm:$0xff]  ;;  %v175_v8 = vld [vmem:[#allocation5 + $0x18] sm:$0xff] }
  0xa9   :  { %v200_v13 = vld [vmem:[#allocation5 + $0xe0] sm:$0xff]  ;;  %v201_v31 = vld [vmem:[#allocation5 + $0xe8] sm:$0xff]  ;;  %v3706_v35 = vcombine.low %v189_v22, %v193_v23  ;;  %v3692_v9 = vcombine.low %v174_v59, %v178_v60  ;;  %v194_v14 = vld [vmem:[#allocation5 + $0xb0] sm:$0xff]  ;;  %v3700_v17 = vcombine.low %v182_v4, %v186_v5 }
  0xaa   :  { %v3713_v24 = vcombine.high %v196_v12, %v200_v13  ;;  %v204_v25 = vld [vmem:[#allocation5 + $0x100] sm:$0xff]  ;;  %v3712_v29 = vcombine.low %v196_v12, %v200_v13  ;;  %v3715_v36 = vcombine.high %v197_v30, %v201_v31  ;;  %v205_v38 = vld [vmem:[#allocation5 + $0x108] sm:$0xff]  ;;  %v3714_v43 = vcombine.low %v197_v30, %v201_v31  ;;  %v190_v13 = vld [vmem:[#allocation5 + $0x90] sm:$0xff] }
  0xab   :  { %601 = vmatpush1.bf16.msra.mxu0 %v3696_v10  ;;  %v208_v26 = vld [vmem:[#allocation5 + $0x120] sm:$0xff]  ;;  %642 = vmatpush1.bf16.msra.mxu1 %v3698_v27  ;;  %v209_v39 = vld [vmem:[#allocation5 + $0x128] sm:$0xff]  ;;  %v179_v10 = vld [vmem:[#allocation5 + $0x38] sm:$0xff]  ;;  %v3709_v19 = vcombine.high %v190_v13, %v194_v14 }
  0xac   :  { %602 = vmatprep.subr.bf16.mxu0 %v3705_v11  ;;  %v3721_v32 = vcombine.high %v204_v25, %v208_v26  ;;  %v212_v33 = vld [vmem:[#allocation5 + $0x140] sm:$0xff]  ;;  %643 = vmatprep.subr.bf16.mxu1 %v3707_v28  ;;  %v3720_v37 = vcombine.low %v204_v25, %v208_v26  ;;  %v3723_v44 = vcombine.high %v205_v38, %v209_v39  ;;  %v213_v46 = vld [vmem:[#allocation5 + $0x148] sm:$0xff]  ;;  %v183_v16 = vld [vmem:[#allocation5 + $0x58] sm:$0xff] }
  0xad   :  { %v216_v34 = vld [vmem:[#allocation5 + $0x160] sm:$0xff]  ;;  %v217_v47 = vld [vmem:[#allocation5 + $0x168] sm:$0xff]  ;;  %v3722_v51 = vcombine.low %v205_v38, %v209_v39  ;;  %v3701_v11 = vcombine.high %v182_v4, %v186_v5  ;;  %v3695_v15 = vcombine.high %v175_v8, %v179_v10  ;;  %v187_v18 = vld [vmem:[#allocation5 + $0x78] sm:$0xff]  ;;  %v3694_v22 = vcombine.low %v175_v8, %v179_v10 }
  0xae   :  { %v3729_v40 = vcombine.high %v212_v33, %v216_v34  ;;  %v220_v41 = vld [vmem:[#allocation5 + $0x180] sm:$0xff]  ;;  %v3728_v45 = vcombine.low %v212_v33, %v216_v34  ;;  %v3731_v52 = vcombine.high %v213_v46, %v217_v47  ;;  %v221_v53 = vld [vmem:[#allocation5 + $0x188] sm:$0xff]  ;;  %v3730_v58 = vcombine.low %v213_v46, %v217_v47  ;;  %v198_v20 = vld [vmem:[#allocation5 + $0xd0] sm:$0xff] }
  0xaf   :  { %603 = vmatpush1.bf16.msra.mxu0 %v3704_v21  ;;  %v224_v42 = vld [vmem:[#allocation5 + $0x1a0] sm:$0xff]  ;;  %644 = vmatpush1.bf16.msra.mxu1 %v3706_v35  ;;  %v225_v55 = vld [vmem:[#allocation5 + $0x1a8] sm:$0xff]  ;;  %v202_v21 = vld [vmem:[#allocation5 + $0xf0] sm:$0xff]  ;;  %v3703_v23 = vcombine.high %v183_v16, %v187_v18  ;;  %v3708_v25 = vcombine.low %v190_v13, %v194_v14  ;;  %v3702_v30 = vcombine.low %v183_v16, %v187_v18 }
  0xb0   :  { %604 = vmatprep.subr.bf16.mxu0 %v3713_v24  ;;  %645 = vmatprep.subr.bf16.mxu1 %v3715_v36  ;;  %v3737_v48 = vcombine.high %v220_v41, %v224_v42  ;;  %v228_v49 = vld [vmem:[#allocation5 + $0x1c0] sm:$0xff]  ;;  %v3736_v54 = vcombine.low %v220_v41, %v224_v42  ;;  %v3739_v61 = vcombine.high %v221_v53, %v225_v55  ;;  %v229_v62 = vld [vmem:[#allocation5 + $0x1c8] sm:$0xff]  ;;  %v191_v24 = vld [vmem:[#allocation5 + $0x98] sm:$0xff] }
  0xb1   :  { %v232_v50 = vld [vmem:[#allocation5 + $0x1e0] sm:$0xff]  ;;  %v233_v1 = vld [vmem:[#allocation5 + $0x1e8] sm:$0xff]  ;;  %v3738_v3 = vcombine.low %v221_v53, %v225_v55  ;;  %v195_v26 = vld [vmem:[#allocation5 + $0xb8] sm:$0xff]  ;;  %v3717_v27 = vcombine.high %v198_v20, %v202_v21  ;;  %v3716_v33 = vcombine.low %v198_v20, %v202_v21 }
  0xb2   :  { %v3745_v56 = vcombine.high %v228_v49, %v232_v50  ;;  %v3744_v63 = vcombine.low %v228_v49, %v232_v50  ;;  %v3747_v7 = vcombine.high %v229_v62, %v233_v1  ;;  %v3746_v12 = vcombine.low %v229_v62, %v233_v1  ;;  %v206_v28 = vld [vmem:[#allocation5 + $0x110] sm:$0xff]  ;;  %v203_v34 = vld [vmem:[#allocation5 + $0xf8] sm:$0xff] }
  0xb3   :  { %605 = vmatpush1.bf16.msra.mxu0 %v3712_v29  ;;  %646 = vmatpush1.bf16.msra.mxu1 %v3714_v43  ;;  %v210_v29 = vld [vmem:[#allocation5 + $0x130] sm:$0xff]  ;;  %v3711_v31 = vcombine.high %v191_v24, %v195_v26  ;;  %v3710_v38 = vcombine.low %v191_v24, %v195_v26  ;;  %v211_v42 = vld [vmem:[#allocation5 + $0x138] sm:$0xff] }
  0xb4   :  { %606 = vmatprep.subr.bf16.mxu0 %v3721_v32  ;;  %647 = vmatprep.subr.bf16.mxu1 %v3723_v44  ;;  %v199_v32 = vld [vmem:[#allocation5 + $0xd8] sm:$0xff]  ;;  %v3725_v35 = vcombine.high %v206_v28, %v210_v29  ;;  %v214_v36 = vld [vmem:[#allocation5 + $0x150] sm:$0xff]  ;;  %v3724_v41 = vcombine.low %v206_v28, %v210_v29 }
  0xb5   :  { %v3719_v39 = vcombine.high %v199_v32, %v203_v34  ;;  %v222_v43 = vld [vmem:[#allocation5 + $0x190] sm:$0xff]  ;;  %v215_v47 = vld [vmem:[#allocation5 + $0x158] sm:$0xff] }
  0xb6   :  { %v226_v44 = vld [vmem:[#allocation5 + $0x1b0] sm:$0xff]  ;;  %v219_v49 = vld [vmem:[#allocation5 + $0x178] sm:$0xff] }
  0xb7   :  { %607 = vmatpush1.bf16.msra.mxu0 %v3720_v37  ;;  %648 = vmatpush1.bf16.msra.mxu1 %v3722_v51  ;;  %v218_v37 = vld [vmem:[#allocation5 + $0x170] sm:$0xff]  ;;  %v3741_v50 = vcombine.high %v222_v43, %v226_v44  ;;  %v223_v55 = vld [vmem:[#allocation5 + $0x198] sm:$0xff]  ;;  %v3734_v59 = vcombine.low %v215_v47, %v219_v49 }
  0xb8   :  { %608 = vmatprep.subr.bf16.mxu0 %v3729_v40  ;;  %649 = vmatprep.subr.bf16.mxu1 %v3731_v52  ;;  %v207_v40 = vld [vmem:[#allocation5 + $0x118] sm:$0xff]  ;;  %v230_v51 = vld [vmem:[#allocation5 + $0x1d0] sm:$0xff] }
  0xb9   :  { %v3727_v46 = vcombine.high %v207_v40, %v211_v42  ;;  %v234_v52 = vld [vmem:[#allocation5 + $0x1f0] sm:$0xff]  ;;  %v3726_v53 = vcombine.low %v207_v40, %v211_v42  ;;  %v227_v57 = vld [vmem:[#allocation5 + $0x1b8] sm:$0xff] }
  0xba   :  { %v231_v60 = vld [vmem:[#allocation5 + $0x1d8] sm:$0xff]  ;;  %v3743_v62 = vcombine.high %v223_v55, %v227_v57  ;;  %v3748_v1 = vcombine.low %v230_v51, %v234_v52  ;;  %v4297_v16 = vld [vmem:[#allocation8 + $0x4c] ss:$16 sps:$4 sm:$0xff]   ;;  %v4307_v26 = vld [vmem:[#allocation8 + $0x88] ss:$16 sps:$4 sm:$0xff]  }
  0xbb   :  { %609 = vmatpush1.bf16.msra.mxu0 %v3728_v45  ;;  %650 = vmatpush1.bf16.msra.mxu1 %v3730_v58  ;;  %v3718_v45 = vcombine.low %v199_v32, %v203_v34  ;;  %v3749_v58 = vcombine.high %v230_v51, %v234_v52  ;;  %v4288_v5 = vld [vmem:[#allocation8 + $0x24] ss:$16 sps:$4 sm:$0xff]   ;;  %v4292_v13 = vld [vmem:[#allocation8 + $0x40] ss:$16 sps:$4 sm:$0xff]   ;;  %v4303_v20 = vld [vmem:[#allocation8 + $0x6c] ss:$16 sps:$4 sm:$0xff]  }
  0xbc   :  { %610 = vmatprep.subr.bf16.mxu0 %v3737_v48  ;;  %651 = vmatprep.subr.bf16.mxu1 %v3739_v61  ;;  %v3732_v48 = vcombine.low %v214_v36, %v218_v37  ;;  %v235_v61 = vld [vmem:[#allocation5 + $0x1f8] sm:$0xff]  ;;  %v4309_v24 = vld [vmem:[#allocation8 + $0x8c] ss:$16 sps:$4 sm:$0xff]   ;;  %v4319_v34 = vld [vmem:[#allocation8 + $0xc8] ss:$16 sps:$4 sm:$0xff]  }
  0xbd   :  { %v3751_v4 = vcombine.high %v231_v60, %v235_v61  ;;  %v3750_v8 = vcombine.low %v231_v60, %v235_v61  ;;  %v4294_v10 = vld [vmem:[#allocation8 + $0x44] ss:$16 sps:$4 sm:$0xff]   ;;  %v4304_v21 = vld [vmem:[#allocation8 + $0x80] ss:$16 sps:$4 sm:$0xff]   ;;  %v4331_v42 = vld [vmem:[#allocation8 + $0x108] ss:$16 sps:$4 sm:$0xff]  }
  0xbe   :  { %v4300_v14 = vld [vmem:[#allocation8 + $0x64] ss:$16 sps:$4 sm:$0xff]   ;;  %v4316_v28 = vld [vmem:[#allocation8 + $0xc0] ss:$16 sps:$4 sm:$0xff]   ;;  %v4369_v61 = vld [vmem:[#allocation8 + $0x1cc] ss:$16 sps:$4 sm:$0xff]  }
  0xbf   :  { %611 = vmatpush1.bf16.msra.mxu0 %v3736_v54  ;;  %652 = vmatpush1.bf16.msra.mxu1 %v3738_v3  ;;  %v3735_v54 = vcombine.high %v215_v47, %v219_v49  ;;  %v4280_v3 = vld [vmem:[#allocation8] ss:$16 sps:$4 sm:$0xff]   ;;  %v4306_v18 = vld [vmem:[#allocation8 + $0x84] ss:$16 sps:$4 sm:$0xff]   ;;  %v4343_v49 = vld [vmem:[#allocation8 + $0x148] ss:$16 sps:$4 sm:$0xff]  }
  0xc0   :  { %612 = vmatprep.subr.bf16.mxu0 %v3745_v56  ;;  %653 = vmatprep.subr.bf16.mxu1 %v3747_v7  ;;  %v3740_v56 = vcombine.low %v222_v43, %v226_v44  ;;  %v4285_v7 = vld [vmem:[#allocation8 + $0xc] ss:$16 sps:$4 sm:$0xff]   ;;  %v4324_v29 = vld [vmem:[#allocation8 + $0xe4] ss:$16 sps:$4 sm:$0xff]   ;;  %v4322_v32 = vld [vmem:[#allocation8 + $0xe0] ss:$16 sps:$4 sm:$0xff]  }
  0xc1   :  { %v4334_v40 = vld [vmem:[#allocation8 + $0x120] ss:$16 sps:$4 sm:$0xff]   ;;  %v4348_v44 = vld [vmem:[#allocation8 + $0x164] ss:$16 sps:$4 sm:$0xff]  }
  0xc2   :  { %v4340_v43 = vld [vmem:[#allocation8 + $0x140] ss:$16 sps:$4 sm:$0xff]   ;;  %v4360_v52 = vld [vmem:[#allocation8 + $0x1a4] ss:$16 sps:$4 sm:$0xff]  }
  0xc3   :  { %613 = vmatpush1.bf16.msra.mxu0 %v3744_v63  ;;  %654 = vmatpush1.bf16.msra.mxu1 %v3746_v12  ;;  %v4282_v63 = vld [vmem:[#allocation8 + $0x4] ss:$16 sps:$4 sm:$0xff]   ;;  %v4291_v12 = vld [vmem:[#allocation8 + $0x2c] ss:$16 sps:$4 sm:$0xff]   ;;  %v4346_v47 = vld [vmem:[#allocation8 + $0x160] ss:$16 sps:$4 sm:$0xff]  }
  0xc4   :  { %680 = vmatprep.subr.bf16.mxu0 %v3693_v2  ;;  %721 = vmatprep.subr.bf16.mxu1 %v3695_v15  ;;  %v3742_v2 = vcombine.low %v223_v55, %v227_v57  ;;  %v4289_v15 = vld [vmem:[#allocation8 + $0x28] ss:$16 sps:$4 sm:$0xff]   ;;  %v4352_v51 = vld [vmem:[#allocation8 + $0x180] ss:$16 sps:$4 sm:$0xff]   ;;  %v4363_v57 = vld [vmem:[#allocation8 + $0x1ac] ss:$16 sps:$4 sm:$0xff]  }
  0xc5   :  { %v4355_v55 = vld [vmem:[#allocation8 + $0x188] ss:$16 sps:$4 sm:$0xff]   ;;  %v4364_v60 = vld [vmem:[#allocation8 + $0x1c0] ss:$16 sps:$4 sm:$0xff]  }
  0xc6   :  { %631 = vmatmul.mubr.bf16.vlgmr.msra.gmra.mrb[0].mxu0 %v5255_v6  ;;  %672 = vmatmul.mubr.bf16.vlgmr.msra.gmra.mrb[0].mxu1 %v5255_v6 }
  0xc7   :  { %681 = vmatpush1.bf16.msra.mxu0 %v3692_v9  ;;  %712 = vmatprep.mubr.bf16.mxu0 %v5049_v0  ;;  %v4286_v9 = vld [vmem:[#allocation8 + $0x20] ss:$16 sps:$4 sm:$0xff]  }
  0xc8   :  { %682 = vmatprep.subr.bf16.mxu0 %v3701_v11  ;;  %722 = vmatpush1.bf16.msra.mxu1 %v3694_v22  ;;  %v4283_v11 = vld [vmem:[#allocation8 + $0x8] ss:$16 sps:$4 sm:$0xff]   ;;  %v4312_v22 = vld [vmem:[#allocation8 + $0xa4] ss:$16 sps:$4 sm:$0xff]  }
  0xc9   :  { %753 = vmatprep.mubr.bf16.mxu1 %v5049_v0  ;;  %723 = vmatprep.subr.bf16.mxu1 %v3703_v23  ;;  %v3733_v0 = vcombine.high %v214_v36, %v218_v37  ;;  %v4301_v23 = vld [vmem:[#allocation8 + $0x68] ss:$16 sps:$4 sm:$0xff]   ;;  %v4328_v36 = vld [vmem:[#allocation8 + $0x100] ss:$16 sps:$4 sm:$0xff]   ;;  %v4336_v37 = vld [vmem:[#allocation8 + $0x124] ss:$16 sps:$4 sm:$0xff]  }
  0xcb   :  { %683 = vmatpush1.bf16.msra.mxu0 %v3700_v17  ;;  %v4298_v17 = vld [vmem:[#allocation8 + $0x60] ss:$16 sps:$4 sm:$0xff]  }
  0xcc   :  { %684 = vmatprep.subr.bf16.mxu0 %v3709_v19  ;;  %724 = vmatpush1.bf16.msra.mxu1 %v3702_v30  ;;  %v4295_v19 = vld [vmem:[#allocation8 + $0x48] ss:$16 sps:$4 sm:$0xff]  }
  0xcd   :  { %725 = vmatprep.subr.bf16.mxu1 %v3711_v31  ;;  %v4313_v30 = vld [vmem:[#allocation8 + $0xa8] ss:$16 sps:$4 sm:$0xff]   ;;  %v4321_v31 = vld [vmem:[#allocation8 + $0xcc] ss:$16 sps:$4 sm:$0xff]  }
  0xcf   :  { %685 = vmatpush1.bf16.msra.mxu0 %v3708_v25  ;;  %v4318_v25 = vld [vmem:[#allocation8 + $0xc4] ss:$16 sps:$4 sm:$0xff]  }
  0xd0   :  { %686 = vmatprep.subr.bf16.mxu0 %v3717_v27  ;;  %726 = vmatpush1.bf16.msra.mxu1 %v3710_v38  ;;  %v4315_v27 = vld [vmem:[#allocation8 + $0xac] ss:$16 sps:$4 sm:$0xff]   ;;  %v4325_v38 = vld [vmem:[#allocation8 + $0xe8] ss:$16 sps:$4 sm:$0xff]  }
  0xd1   :  { %727 = vmatprep.subr.bf16.mxu1 %v3719_v39  ;;  %v4333_v39 = vld [vmem:[#allocation8 + $0x10c] ss:$16 sps:$4 sm:$0xff]  }
  0xd3   :  { %687 = vmatpush1.bf16.msra.mxu0 %v3716_v33  ;;  %v4330_v33 = vld [vmem:[#allocation8 + $0x104] ss:$16 sps:$4 sm:$0xff]  }
  0xd4   :  { %688 = vmatprep.subr.bf16.mxu0 %v3725_v35  ;;  %728 = vmatpush1.bf16.msra.mxu1 %v3718_v45  ;;  %v4327_v35 = vld [vmem:[#allocation8 + $0xec] ss:$16 sps:$4 sm:$0xff]   ;;  %v4337_v45 = vld [vmem:[#allocation8 + $0x128] ss:$16 sps:$4 sm:$0xff]  }
  0xd5   :  { %729 = vmatprep.subr.bf16.mxu1 %v3727_v46  ;;  %v4345_v46 = vld [vmem:[#allocation8 + $0x14c] ss:$16 sps:$4 sm:$0xff]  }
  0xd7   :  { %689 = vmatpush1.bf16.msra.mxu0 %v3724_v41  ;;  %v4342_v41 = vld [vmem:[#allocation8 + $0x144] ss:$16 sps:$4 sm:$0xff]  }
  0xd8   :  { %690 = vmatprep.subr.bf16.mxu0 %v3733_v0  ;;  %730 = vmatpush1.bf16.msra.mxu1 %v3726_v53  ;;  %v4339_v0 = vld [vmem:[#allocation8 + $0x12c] ss:$16 sps:$4 sm:$0xff]   ;;  %v4349_v53 = vld [vmem:[#allocation8 + $0x168] ss:$16 sps:$4 sm:$0xff]  }
  0xd9   :  { %731 = vmatprep.subr.bf16.mxu1 %v3735_v54  ;;  %v4357_v54 = vld [vmem:[#allocation8 + $0x18c] ss:$16 sps:$4 sm:$0xff]  }
  0xdb   :  { %691 = vmatpush1.bf16.msra.mxu0 %v3732_v48  ;;  %v4354_v48 = vld [vmem:[#allocation8 + $0x184] ss:$16 sps:$4 sm:$0xff]  }
  0xdc   :  { %692 = vmatprep.subr.bf16.mxu0 %v3741_v50  ;;  %732 = vmatpush1.bf16.msra.mxu1 %v3734_v59  ;;  %v4351_v50 = vld [vmem:[#allocation8 + $0x16c] ss:$16 sps:$4 sm:$0xff]   ;;  %v4361_v59 = vld [vmem:[#allocation8 + $0x1a8] ss:$16 sps:$4 sm:$0xff]  }
  0xdd   :  { %733 = vmatprep.subr.bf16.mxu1 %v3743_v62  ;;  %v4372_v62 = vld [vmem:[#allocation8 + $0x1e4] ss:$16 sps:$4 sm:$0xff]  }
  0xdf   :  { %693 = vmatpush1.bf16.msra.mxu0 %v3740_v56  ;;  %v4358_v56 = vld [vmem:[#allocation8 + $0x1a0] ss:$16 sps:$4 sm:$0xff]  }
  0xe0   :  { %694 = vmatprep.subr.bf16.mxu0 %v3749_v58  ;;  %734 = vmatpush1.bf16.msra.mxu1 %v3742_v2  ;;  %v4366_v58 = vld [vmem:[#allocation8 + $0x1c4] ss:$16 sps:$4 sm:$0xff]   ;;  %v4375_v2 = vld [vmem:[#allocation8 + $0x1ec] ss:$16 sps:$4 sm:$0xff]  }
  0xe1   :  { %735 = vmatprep.subr.bf16.mxu1 %v3751_v4  ;;  %v4373_v4 = vld [vmem:[#allocation8 + $0x1e8] ss:$16 sps:$4 sm:$0xff]  }
  0xe3   :  { %695 = vmatpush1.bf16.msra.mxu0 %v3748_v1  ;;  %v4370_v1 = vld [vmem:[#allocation8 + $0x1e0] ss:$16 sps:$4 sm:$0xff]  }
  0xe4   :  { %2336 = vmatprep.subr.bf16.mxu0 %v4282_v63  ;;  %736 = vmatpush1.bf16.msra.mxu1 %v3750_v8  ;;  %v4367_v63 = vld [vmem:[#allocation8 + $0x1c8] ss:$16 sps:$4 sm:$0xff]  }
  0xe5   :  { %2500 = vmatprep.subr.bf16.mxu1 %v4285_v7  ;;  %v238_v7 = vlaneseq }
  0xe6   :  { %713 = vmatmul.mubr.bf16.vlgmr.msra.gmra.mrb[4].mxu0 %v5255_v6 }
  0xe7   :  { %2337 = vmatpush1.bf16.msra.mxu0 %v4280_v3  ;;  %754 = vmatmul.mubr.bf16.vlgmr.msra.gmra.mrb[4].mxu1 %v5255_v6  ;;  %v4310_v6 = vld [vmem:[#allocation8 + $0xa0] ss:$16 sps:$4 sm:$0xff]   ;;  %v4378_v3 = vld [vmem:[#allocation8 + $0x204] ss:$16 sps:$4 sm:$0xff]   ;;  %v5263_v8 = vshrl.u32 %v238_v7, 7 }
  0xe8   :  { %2338 = vmatprep.subr.bf16.mxu0 %v4288_v5  ;;  %2501 = vmatpush1.bf16.msra.mxu1 %v4283_v11  ;;  %v4381_v5 = vld [vmem:[#allocation8 + $0x20c] ss:$16 sps:$4 sm:$0xff]   ;;  %v4432_v7 = vld [vmem:[#allocation8 + $0x324] ss:$16 sps:$4 sm:$0xff]  }
  0xe9   :  { %2502 = vmatprep.subr.bf16.mxu1 %v4291_v12  ;;  %v5271_v11 = vsub.s32 1, %v5263_v8 }
  0xeb   :  { %2339 = vmatpush1.bf16.msra.mxu0 %v4286_v9  ;;  %v5266_v9 = vsub.s32 0, %v5263_v8 }
  0xec   :  { %2340 = vmatprep.subr.bf16.mxu0 %v4294_v10  ;;  %2503 = vmatpush1.bf16.msra.mxu1 %v4289_v15  ;;  %v5268_v10 = vld [vmem:[#allocation7] sm:$0xff]  ;;  %v252_v15 = vsub.s32 3, %v5263_v8 }
  0xed   :  { %2504 = vmatprep.subr.bf16.mxu1 %v4297_v16  ;;  %v241_v12 = vrot.slane %v5268_v10, %v5266_v9 }
  0xef   :  { %2341 = vmatpush1.bf16.msra.mxu0 %v4292_v13  ;;  %v245_v13 = vrot.slane %v5268_v10, %v5271_v11 }
  0xf0   :  { %2342 = vmatprep.subr.bf16.mxu0 %v4300_v14  ;;  %2505 = vmatpush1.bf16.msra.mxu1 %v4295_v19 }
  0xf1   :  { %2506 = vmatprep.subr.bf16.mxu1 %v4303_v20 }
  0xf3   :  { %2343 = vmatpush1.bf16.msra.mxu0 %v4298_v17 }
  0xf4   :  { %2344 = vmatprep.subr.bf16.mxu0 %v4306_v18  ;;  %2507 = vmatpush1.bf16.msra.mxu1 %v4301_v23  ;;  %v253_v23 = vrot.slane %v5268_v10, %v252_v15 }
  0xf5   :  { %2508 = vmatprep.subr.bf16.mxu1 %v4309_v24 }
  0xf7   :  { %2345 = vmatpush1.bf16.msra.mxu0 %v4304_v21 }
  0xf8   :  { %2346 = vmatprep.subr.bf16.mxu0 %v4312_v22  ;;  %2509 = vmatpush1.bf16.msra.mxu1 %v4307_v26 }
  0xf9   :  { %2510 = vmatprep.subr.bf16.mxu1 %v4315_v27 }
  0xfb   :  { %2347 = vmatpush1.bf16.msra.mxu0 %v4310_v6  ;;  %v4376_v6 = vld [vmem:[#allocation8 + $0x200] ss:$16 sps:$4 sm:$0xff]  }
  0xfc   :  { %2348 = vmatprep.subr.bf16.mxu0 %v4318_v25  ;;  %2511 = vmatpush1.bf16.msra.mxu1 %v4313_v30  ;;  %v4379_v25 = vld [vmem:[#allocation8 + $0x208] ss:$16 sps:$4 sm:$0xff]  }
  0xfd   :  { %2512 = vmatprep.subr.bf16.mxu1 %v4321_v31 }
  0xff   :  { %2349 = vmatpush1.bf16.msra.mxu0 %v4316_v28  ;;  %v4384_v28 = vld [vmem:[#allocation8 + $0x224] ss:$16 sps:$4 sm:$0xff]  }
 0x100   :  { %2350 = vmatprep.subr.bf16.mxu0 %v4324_v29  ;;  %2513 = vmatpush1.bf16.msra.mxu1 %v4319_v34  ;;  %v4387_v29 = vld [vmem:[#allocation8 + $0x22c] ss:$16 sps:$4 sm:$0xff]   ;;  %v4382_v34 = vld [vmem:[#allocation8 + $0x220] ss:$16 sps:$4 sm:$0xff]  }
 0x101   :  { %2514 = vmatprep.subr.bf16.mxu1 %v4327_v35  ;;  %v4385_v35 = vld [vmem:[#allocation8 + $0x228] ss:$16 sps:$4 sm:$0xff]  }
 0x103   :  { %2351 = vmatpush1.bf16.msra.mxu0 %v4322_v32 }
 0x104   :  { %2352 = vmatprep.subr.bf16.mxu0 %v4330_v33  ;;  %2515 = vmatpush1.bf16.msra.mxu1 %v4325_v38  ;;  %v4393_v38 = vld [vmem:[#allocation8 + $0x24c] ss:$16 sps:$4 sm:$0xff]  }
 0x105   :  { %2516 = vmatprep.subr.bf16.mxu1 %v4333_v39 }
 0x107   :  { %2353 = vmatpush1.bf16.msra.mxu0 %v4328_v36 }
 0x108   :  { %2354 = vmatprep.subr.bf16.mxu0 %v4336_v37  ;;  %2517 = vmatpush1.bf16.msra.mxu1 %v4331_v42  ;;  %v4390_v37 = vld [vmem:[#allocation8 + $0x244] ss:$16 sps:$4 sm:$0xff]  }
 0x109   :  { %2518 = vmatprep.subr.bf16.mxu1 %v4339_v0  ;;  %v4396_v42 = vld [vmem:[#allocation8 + $0x264] ss:$16 sps:$4 sm:$0xff]   ;;  %v4399_v0 = vld [vmem:[#allocation8 + $0x26c] ss:$16 sps:$4 sm:$0xff]  }
 0x10b   :  { %2355 = vmatpush1.bf16.msra.mxu0 %v4334_v40  ;;  %v4388_v40 = vld [vmem:[#allocation8 + $0x240] ss:$16 sps:$4 sm:$0xff]  }
 0x10c   :  { %2356 = vmatprep.subr.bf16.mxu0 %v4342_v41  ;;  %2519 = vmatpush1.bf16.msra.mxu1 %v4337_v45  ;;  %v4391_v41 = vld [vmem:[#allocation8 + $0x248] ss:$16 sps:$4 sm:$0xff]   ;;  %v4402_v45 = vld [vmem:[#allocation8 + $0x284] ss:$16 sps:$4 sm:$0xff]  }
 0x10d   :  { %2520 = vmatprep.subr.bf16.mxu1 %v4345_v46  ;;  %v4405_v46 = vld [vmem:[#allocation8 + $0x28c] ss:$16 sps:$4 sm:$0xff]  }
 0x10f   :  { %2357 = vmatpush1.bf16.msra.mxu0 %v4340_v43  ;;  %v4394_v43 = vld [vmem:[#allocation8 + $0x260] ss:$16 sps:$4 sm:$0xff]  }
 0x110   :  { %2358 = vmatprep.subr.bf16.mxu0 %v4348_v44  ;;  %2521 = vmatpush1.bf16.msra.mxu1 %v4343_v49  ;;  %v4397_v44 = vld [vmem:[#allocation8 + $0x268] ss:$16 sps:$4 sm:$0xff]   ;;  %v4408_v49 = vld [vmem:[#allocation8 + $0x2a4] ss:$16 sps:$4 sm:$0xff]  }
 0x111   :  { %2522 = vmatprep.subr.bf16.mxu1 %v4351_v50  ;;  %v4411_v50 = vld [vmem:[#allocation8 + $0x2ac] ss:$16 sps:$4 sm:$0xff]  }
 0x113   :  { %2359 = vmatpush1.bf16.msra.mxu0 %v4346_v47  ;;  %v4400_v47 = vld [vmem:[#allocation8 + $0x280] ss:$16 sps:$4 sm:$0xff]  }
 0x114   :  { %2360 = vmatprep.subr.bf16.mxu0 %v4354_v48  ;;  %2523 = vmatpush1.bf16.msra.mxu1 %v4349_v53  ;;  %v4403_v48 = vld [vmem:[#allocation8 + $0x288] ss:$16 sps:$4 sm:$0xff]   ;;  %v4414_v53 = vld [vmem:[#allocation8 + $0x2c4] ss:$16 sps:$4 sm:$0xff]  }
 0x115   :  { %2524 = vmatprep.subr.bf16.mxu1 %v4357_v54  ;;  %v4417_v54 = vld [vmem:[#allocation8 + $0x2cc] ss:$16 sps:$4 sm:$0xff]  }
 0x117   :  { %2361 = vmatpush1.bf16.msra.mxu0 %v4352_v51  ;;  %v4406_v51 = vld [vmem:[#allocation8 + $0x2a0] ss:$16 sps:$4 sm:$0xff]  }
 0x118   :  { %2362 = vmatprep.subr.bf16.mxu0 %v4360_v52  ;;  %2525 = vmatpush1.bf16.msra.mxu1 %v4355_v55  ;;  %v4409_v52 = vld [vmem:[#allocation8 + $0x2a8] ss:$16 sps:$4 sm:$0xff]   ;;  %v4412_v55 = vld [vmem:[#allocation8 + $0x2c0] ss:$16 sps:$4 sm:$0xff]  }
 0x119   :  { %2526 = vmatprep.subr.bf16.mxu1 %v4363_v57  ;;  %v4420_v57 = vld [vmem:[#allocation8 + $0x2e4] ss:$16 sps:$4 sm:$0xff]  }
 0x11b   :  { %2363 = vmatpush1.bf16.msra.mxu0 %v4358_v56  ;;  %v4415_v56 = vld [vmem:[#allocation8 + $0x2c8] ss:$16 sps:$4 sm:$0xff]  }
 0x11c   :  { %2364 = vmatprep.subr.bf16.mxu0 %v4366_v58  ;;  %2527 = vmatpush1.bf16.msra.mxu1 %v4361_v59  ;;  %v4423_v58 = vld [vmem:[#allocation8 + $0x2ec] ss:$16 sps:$4 sm:$0xff]  }
 0x11d   :  { %2528 = vmatprep.subr.bf16.mxu1 %v4369_v61  ;;  %v4418_v61 = vld [vmem:[#allocation8 + $0x2e0] ss:$16 sps:$4 sm:$0xff]  }
 0x11f   :  { %2365 = vmatpush1.bf16.msra.mxu0 %v4364_v60 }
 0x120   :  { %2366 = vmatprep.subr.bf16.mxu0 %v4372_v62  ;;  %2529 = vmatpush1.bf16.msra.mxu1 %v4367_v63  ;;  %v4421_v62 = vld [vmem:[#allocation8 + $0x2e8] ss:$16 sps:$4 sm:$0xff]  }
 0x121   :  { %2530 = vmatprep.subr.bf16.mxu1 %v4375_v2  ;;  %v4429_v2 = vld [vmem:[#allocation8 + $0x30c] ss:$16 sps:$4 sm:$0xff]  }
 0x123   :  { %2367 = vmatpush1.bf16.msra.mxu0 %v4370_v1  ;;  %v4426_v1 = vld [vmem:[#allocation8 + $0x304] ss:$16 sps:$4 sm:$0xff]  }
 0x124   :  { %2377 = vmatprep.subr.bf16.mxu0 %v4378_v3  ;;  %2531 = vmatpush1.bf16.msra.mxu1 %v4373_v4  ;;  %v4424_v4 = vld [vmem:[#allocation8 + $0x300] ss:$16 sps:$4 sm:$0xff]  }
 0x125   :  { %2541 = vmatprep.subr.bf16.mxu1 %v4381_v5  ;;  %v4427_v5 = vld [vmem:[#allocation8 + $0x308] ss:$16 sps:$4 sm:$0xff]  }
 0x199   :  { %v632_v14 = vpop.f32.mrb[0].mxu0  ;;  %v5281_v26 = vpop.f32.mrb[0].mxu1 }
 0x19a   :  { %v633_v16 = vadd.f32 %v632_v14, %v241_v12  ;;  %v634_v17 = vpop.f32.mrb[1].mxu0  ;;  %v675_v30 = vpop.f32.mrb[1].mxu1  ;;  %v4435_v12 = vld [vmem:[#allocation8 + $0x32c] ss:$16 sps:$4 sm:$0xff]   ;;  %v4433_v14 = vld [vmem:[#allocation8 + $0x328] ss:$16 sps:$4 sm:$0xff]  }
 0x19b   :  { %v635_v18 = vadd.f32 %v634_v17, %v245_v13  ;;  %v636_v19 = vpop.f32.mrb[2].mxu0  ;;  %v676_v31 = vadd.f32 %v675_v30, %v253_v23  ;;  %v677_v32 = vpop.f32.mrb[2].mxu1  ;;  %v4430_v13 = vld [vmem:[#allocation8 + $0x320] ss:$16 sps:$4 sm:$0xff]   ;;  %v4441_v17 = vld [vmem:[#allocation8 + $0x34c] ss:$16 sps:$4 sm:$0xff]  }
 0x19c   :  { %v762_v20 = vmax.f32 %v633_v16, 0.0  ;;  %v637_v21 = vpop.f32.mrb[3].mxu0  ;;  %v678_v33 = vpop.f32.mrb[3].mxu1  ;;  %v4438_v16 = vld [vmem:[#allocation8 + $0x344] ss:$16 sps:$4 sm:$0xff]  }
 0x19d   :  { %v763_v22 = vmax.f32 %v635_v18, 0.0  ;;  %v765_v36 = vmax.f32 %v676_v31, 0.0  ;;  %v4436_v18 = vld [vmem:[#allocation8 + $0x340] ss:$16 sps:$4 sm:$0xff]   ;;  %v4439_v19 = vld [vmem:[#allocation8 + $0x348] ss:$16 sps:$4 sm:$0xff]  }
 0x19e   :  { %v770_v27 = vpack.c.bf16 %v762_v20, %v762_v20  ;;  %v4444_v20 = vld [vmem:[#allocation8 + $0x364] ss:$16 sps:$4 sm:$0xff]   ;;  %v4447_v21 = vld [vmem:[#allocation8 + $0x36c] ss:$16 sps:$4 sm:$0xff]   ;;  %v4445_v23 = vld [vmem:[#allocation8 + $0x368] ss:$16 sps:$4 sm:$0xff]  }
 0x19f   :  { %v771_v24 = vpack.c.bf16 %v763_v22, %v763_v22  ;;  %v773_v39 = vpack.c.bf16 %v765_v36, %v765_v36  ;;  %v4442_v22 = vld [vmem:[#allocation8 + $0x360] ss:$16 sps:$4 sm:$0xff]   ;;  %v4459_v30 = vld [vmem:[#allocation8 + $0x3ac] ss:$16 sps:$4 sm:$0xff]   ;;  %v260_v31 = vsub.s32 5, %v5263_v8 }
 0x1a0   :  { %v4454_v33 = vld [vmem:[#allocation8 + $0x3a0] ss:$16 sps:$4 sm:$0xff]   ;;  %v4462_v36 = vld [vmem:[#allocation8 + $0x3c4] ss:$16 sps:$4 sm:$0xff]  }
 0x1a1   :  { %2368 = vmatprep.mubr.bf16.mxu0 %v771_v24  ;;  %2532 = vmatprep.mubr.bf16.mxu1 %v771_v24  ;;  %v4450_v24 = vld [vmem:[#allocation8 + $0x384] ss:$16 sps:$4 sm:$0xff]  }
 0x1a2   :  { %2369 = vmatmul.mubr.bf16.vlgmr.msra.gmra.mrb[8].mxu0 %v770_v27  ;;  %2533 = vmatmul.mubr.bf16.vlgmr.msra.gmra.mrb[8].mxu1 %v770_v27  ;;  %v4448_v27 = vld [vmem:[#allocation8 + $0x380] ss:$16 sps:$4 sm:$0xff]  }
 0x1a3   :  { %2378 = vmatpush1.bf16.msra.mxu0 %v4376_v6  ;;  %2542 = vmatpush1.bf16.msra.mxu1 %v4379_v25  ;;  %v4453_v6 = vld [vmem:[#allocation8 + $0x38c] ss:$16 sps:$4 sm:$0xff]   ;;  %v248_v25 = vsub.s32 2, %v5263_v8 }
 0x1a4   :  { %2379 = vmatprep.subr.bf16.mxu0 %v4384_v28  ;;  %2543 = vmatprep.subr.bf16.mxu1 %v4387_v29  ;;  %v4451_v28 = vld [vmem:[#allocation8 + $0x388] ss:$16 sps:$4 sm:$0xff]   ;;  %v4456_v29 = vld [vmem:[#allocation8 + $0x3a4] ss:$16 sps:$4 sm:$0xff]  }
 0x1a5   :  { %2409 = vmatprep.mubr.bf16.mxu0 %v773_v39  ;;  %2573 = vmatprep.mubr.bf16.mxu1 %v773_v39  ;;  %v249_v32 = vrot.slane %v5268_v10, %v248_v25  ;;  %v261_v39 = vrot.slane %v5268_v10, %v260_v31  ;;  %v4520_v31 = vld [vmem:[#allocation8 + $0x500] ss:$16 sps:$4 sm:$0xff]  }
 0x1a7   :  { %2380 = vmatpush1.bf16.msra.mxu0 %v4382_v34  ;;  %2544 = vmatpush1.bf16.msra.mxu1 %v4385_v35  ;;  %v4457_v34 = vld [vmem:[#allocation8 + $0x3a8] ss:$16 sps:$4 sm:$0xff]  }
 0x1a8   :  { %2381 = vmatprep.subr.bf16.mxu0 %v4390_v37  ;;  %2545 = vmatprep.subr.bf16.mxu1 %v4393_v38  ;;  %v4465_v37 = vld [vmem:[#allocation8 + $0x3cc] ss:$16 sps:$4 sm:$0xff]  }
 0x1ab   :  { %2382 = vmatpush1.bf16.msra.mxu0 %v4388_v40  ;;  %2546 = vmatpush1.bf16.msra.mxu1 %v4391_v41  ;;  %v674_v41 = vadd.f32 %v5281_v26, %v249_v32  ;;  %v4477_v26 = vld [vmem:[#allocation8 + $0x40c] ss:$16 sps:$4 sm:$0xff]   ;;  %v4523_v32 = vld [vmem:[#allocation8 + $0x508] ss:$16 sps:$4 sm:$0xff]  }
 0x1ac   :  { %2383 = vmatprep.subr.bf16.mxu0 %v4396_v42  ;;  %2547 = vmatprep.subr.bf16.mxu1 %v4399_v0  ;;  %v4460_v0 = vld [vmem:[#allocation8 + $0x3c0] ss:$16 sps:$4 sm:$0xff]  }
 0x1af   :  { %2384 = vmatpush1.bf16.msra.mxu0 %v4394_v43  ;;  %2548 = vmatpush1.bf16.msra.mxu1 %v4397_v44  ;;  %v4463_v43 = vld [vmem:[#allocation8 + $0x3c8] ss:$16 sps:$4 sm:$0xff]   ;;  %v4468_v44 = vld [vmem:[#allocation8 + $0x3e4] ss:$16 sps:$4 sm:$0xff]  }
 0x1b0   :  { %2385 = vmatprep.subr.bf16.mxu0 %v4402_v45  ;;  %2549 = vmatprep.subr.bf16.mxu1 %v4405_v46  ;;  %v4471_v45 = vld [vmem:[#allocation8 + $0x3ec] ss:$16 sps:$4 sm:$0xff]  }
 0x1b3   :  { %2386 = vmatpush1.bf16.msra.mxu0 %v4400_v47  ;;  %2550 = vmatpush1.bf16.msra.mxu1 %v4403_v48  ;;  %v764_v47 = vmax.f32 %v674_v41, 0.0  ;;  %v4466_v48 = vld [vmem:[#allocation8 + $0x3e0] ss:$16 sps:$4 sm:$0xff]  }
 0x1b4   :  { %2387 = vmatprep.subr.bf16.mxu0 %v4408_v49  ;;  %2551 = vmatprep.subr.bf16.mxu1 %v4411_v50  ;;  %v4469_v49 = vld [vmem:[#allocation8 + $0x3e8] ss:$16 sps:$4 sm:$0xff]   ;;  %v4474_v50 = vld [vmem:[#allocation8 + $0x404] ss:$16 sps:$4 sm:$0xff]   ;;  %v4532_v41 = vld [vmem:[#allocation8 + $0x540] ss:$16 sps:$4 sm:$0xff]  }
 0x1b7   :  { %2388 = vmatpush1.bf16.msra.mxu0 %v4406_v51  ;;  %2552 = vmatpush1.bf16.msra.mxu1 %v4409_v52  ;;  %v772_v52 = vpack.c.bf16 %v764_v47, %v764_v47  ;;  %v4549_v47 = vld [vmem:[#allocation8 + $0x58c] ss:$16 sps:$4 sm:$0xff]  }
 0x1b8   :  { %2389 = vmatprep.subr.bf16.mxu0 %v4414_v53  ;;  %2553 = vmatprep.subr.bf16.mxu1 %v4417_v54  ;;  %v4472_v53 = vld [vmem:[#allocation8 + $0x400] ss:$16 sps:$4 sm:$0xff]   ;;  %v4475_v54 = vld [vmem:[#allocation8 + $0x408] ss:$16 sps:$4 sm:$0xff]  }
 0x1b9   :  { %v5283_v59 = vpop.f32.mrb[4].mxu0 }
 0x1ba   :  { %v5285_v60 = vpop.f32.mrb[5].mxu0  ;;  %v5292_v35 = vpop.f32.mrb[4].mxu1 }
 0x1bb   :  { %2390 = vmatpush1.bf16.msra.mxu0 %v4412_v55  ;;  %2554 = vmatpush1.bf16.msra.mxu1 %v4415_v56  ;;  %v718_v63 = vpop.f32.mrb[6].mxu0  ;;  %v5294_v38 = vpop.f32.mrb[5].mxu1  ;;  %v717_v46 = vadd.f32 %v5285_v60, %v261_v39  ;;  %v4480_v55 = vld [vmem:[#allocation8 + $0x424] ss:$16 sps:$4 sm:$0xff]   ;;  %v4483_v56 = vld [vmem:[#allocation8 + $0x42c] ss:$16 sps:$4 sm:$0xff]  }
 0x1bc   :  { %2391 = vmatprep.subr.bf16.mxu0 %v4420_v57  ;;  %2555 = vmatprep.subr.bf16.mxu1 %v4423_v58  ;;  %v719_v3 = vpop.f32.mrb[7].mxu0  ;;  %v759_v40 = vpop.f32.mrb[6].mxu1  ;;  %v4478_v58 = vld [vmem:[#allocation8 + $0x420] ss:$16 sps:$4 sm:$0xff]   ;;  %v4481_v60 = vld [vmem:[#allocation8 + $0x428] ss:$16 sps:$4 sm:$0xff]  }
 0x1bd   :  { %v760_v42 = vpop.f32.mrb[7].mxu1  ;;  %v767_v51 = vmax.f32 %v717_v46, 0.0  ;;  %v4484_v63 = vld [vmem:[#allocation8 + $0x440] ss:$16 sps:$4 sm:$0xff]   ;;  %v4495_v3 = vld [vmem:[#allocation8 + $0x46c] ss:$16 sps:$4 sm:$0xff]  }
 0x1be   :  { %v4534_v39 = vld [vmem:[#allocation8 + $0x544] ss:$16 sps:$4 sm:$0xff]   ;;  %v4537_v40 = vld [vmem:[#allocation8 + $0x54c] ss:$16 sps:$4 sm:$0xff]   ;;  %v4535_v42 = vld [vmem:[#allocation8 + $0x548] ss:$16 sps:$4 sm:$0xff]  }
 0x1bf   :  { %2392 = vmatpush1.bf16.msra.mxu0 %v4418_v61  ;;  %2556 = vmatpush1.bf16.msra.mxu1 %v4421_v62  ;;  %v775_v57 = vpack.c.bf16 %v767_v51, %v767_v51  ;;  %v4486_v61 = vld [vmem:[#allocation8 + $0x444] ss:$16 sps:$4 sm:$0xff]   ;;  %v4489_v62 = vld [vmem:[#allocation8 + $0x44c] ss:$16 sps:$4 sm:$0xff]  }
 0x1c0   :  { %2393 = vmatprep.subr.bf16.mxu0 %v4426_v1  ;;  %2557 = vmatprep.subr.bf16.mxu1 %v4429_v2  ;;  %v4487_v1 = vld [vmem:[#allocation8 + $0x448] ss:$16 sps:$4 sm:$0xff]   ;;  %v4492_v2 = vld [vmem:[#allocation8 + $0x464] ss:$16 sps:$4 sm:$0xff]   ;;  %v4555_v51 = vld [vmem:[#allocation8 + $0x5ac] ss:$16 sps:$4 sm:$0xff]  }
 0x1c1   :  { %v4546_v46 = vld [vmem:[#allocation8 + $0x584] ss:$16 sps:$4 sm:$0xff]  }
 0x1c3   :  { %2394 = vmatpush1.bf16.msra.mxu0 %v4424_v4  ;;  %2558 = vmatpush1.bf16.msra.mxu1 %v4427_v5  ;;  %v4490_v4 = vld [vmem:[#allocation8 + $0x460] ss:$16 sps:$4 sm:$0xff]   ;;  %v4493_v5 = vld [vmem:[#allocation8 + $0x468] ss:$16 sps:$4 sm:$0xff]  }
 0x1c4   :  { %2395 = vmatprep.subr.bf16.mxu0 %v4432_v7  ;;  %2559 = vmatprep.subr.bf16.mxu1 %v4435_v12  ;;  %v4498_v7 = vld [vmem:[#allocation8 + $0x484] ss:$16 sps:$4 sm:$0xff]   ;;  %v4501_v12 = vld [vmem:[#allocation8 + $0x48c] ss:$16 sps:$4 sm:$0xff]  }
 0x1c7   :  { %2396 = vmatpush1.bf16.msra.mxu0 %v4430_v13  ;;  %2560 = vmatpush1.bf16.msra.mxu1 %v4433_v14  ;;  %v4496_v13 = vld [vmem:[#allocation8 + $0x480] ss:$16 sps:$4 sm:$0xff]   ;;  %v4499_v14 = vld [vmem:[#allocation8 + $0x488] ss:$16 sps:$4 sm:$0xff]  }
 0x1c8   :  { %2397 = vmatprep.subr.bf16.mxu0 %v4438_v16  ;;  %2561 = vmatprep.subr.bf16.mxu1 %v4441_v17  ;;  %v4504_v16 = vld [vmem:[#allocation8 + $0x4a4] ss:$16 sps:$4 sm:$0xff]   ;;  %v4507_v17 = vld [vmem:[#allocation8 + $0x4ac] ss:$16 sps:$4 sm:$0xff]  }
 0x1cb   :  { %2398 = vmatpush1.bf16.msra.mxu0 %v4436_v18  ;;  %2562 = vmatpush1.bf16.msra.mxu1 %v4439_v19  ;;  %v4502_v18 = vld [vmem:[#allocation8 + $0x4a0] ss:$16 sps:$4 sm:$0xff]   ;;  %v4505_v19 = vld [vmem:[#allocation8 + $0x4a8] ss:$16 sps:$4 sm:$0xff]  }
 0x1cc   :  { %2399 = vmatprep.subr.bf16.mxu0 %v4444_v20  ;;  %2563 = vmatprep.subr.bf16.mxu1 %v4447_v21  ;;  %v4510_v20 = vld [vmem:[#allocation8 + $0x4c4] ss:$16 sps:$4 sm:$0xff]   ;;  %v4513_v21 = vld [vmem:[#allocation8 + $0x4cc] ss:$16 sps:$4 sm:$0xff]  }
 0x1cf   :  { %2400 = vmatpush1.bf16.msra.mxu0 %v4442_v22  ;;  %2564 = vmatpush1.bf16.msra.mxu1 %v4445_v23  ;;  %v4508_v22 = vld [vmem:[#allocation8 + $0x4c0] ss:$16 sps:$4 sm:$0xff]   ;;  %v4511_v23 = vld [vmem:[#allocation8 + $0x4c8] ss:$16 sps:$4 sm:$0xff]  }
 0x1d0   :  { %2401 = vmatprep.subr.bf16.mxu0 %v4450_v24  ;;  %2565 = vmatprep.subr.bf16.mxu1 %v4453_v6  ;;  %v4516_v24 = vld [vmem:[#allocation8 + $0x4e4] ss:$16 sps:$4 sm:$0xff]   ;;  %v4519_v6 = vld [vmem:[#allocation8 + $0x4ec] ss:$16 sps:$4 sm:$0xff]  }
 0x1d3   :  { %2402 = vmatpush1.bf16.msra.mxu0 %v4448_v27  ;;  %2566 = vmatpush1.bf16.msra.mxu1 %v4451_v28  ;;  %v4514_v27 = vld [vmem:[#allocation8 + $0x4e0] ss:$16 sps:$4 sm:$0xff]   ;;  %v4517_v28 = vld [vmem:[#allocation8 + $0x4e8] ss:$16 sps:$4 sm:$0xff]  }
 0x1d4   :  { %2403 = vmatprep.subr.bf16.mxu0 %v4456_v29  ;;  %2567 = vmatprep.subr.bf16.mxu1 %v4459_v30  ;;  %v4522_v29 = vld [vmem:[#allocation8 + $0x504] ss:$16 sps:$4 sm:$0xff]   ;;  %v4525_v30 = vld [vmem:[#allocation8 + $0x50c] ss:$16 sps:$4 sm:$0xff]  }
 0x1d7   :  { %2404 = vmatpush1.bf16.msra.mxu0 %v4454_v33  ;;  %2568 = vmatpush1.bf16.msra.mxu1 %v4457_v34  ;;  %v4528_v33 = vld [vmem:[#allocation8 + $0x524] ss:$16 sps:$4 sm:$0xff]   ;;  %v4531_v34 = vld [vmem:[#allocation8 + $0x52c] ss:$16 sps:$4 sm:$0xff]  }
 0x1d8   :  { %2405 = vmatprep.subr.bf16.mxu0 %v4462_v36  ;;  %2569 = vmatprep.subr.bf16.mxu1 %v4465_v37  ;;  %v4526_v36 = vld [vmem:[#allocation8 + $0x520] ss:$16 sps:$4 sm:$0xff]   ;;  %v4529_v37 = vld [vmem:[#allocation8 + $0x528] ss:$16 sps:$4 sm:$0xff]  }
 0x1db   :  { %2406 = vmatpush1.bf16.msra.mxu0 %v4460_v0  ;;  %2570 = vmatpush1.bf16.msra.mxu1 %v4463_v43  ;;  %v4540_v0 = vld [vmem:[#allocation8 + $0x564] ss:$16 sps:$4 sm:$0xff]   ;;  %v4543_v43 = vld [vmem:[#allocation8 + $0x56c] ss:$16 sps:$4 sm:$0xff]  }
 0x1dc   :  { %2407 = vmatprep.subr.bf16.mxu0 %v4468_v44  ;;  %2571 = vmatprep.subr.bf16.mxu1 %v4471_v45  ;;  %v4538_v44 = vld [vmem:[#allocation8 + $0x560] ss:$16 sps:$4 sm:$0xff]   ;;  %v4541_v45 = vld [vmem:[#allocation8 + $0x568] ss:$16 sps:$4 sm:$0xff]  }
 0x1df   :  { %2408 = vmatpush1.bf16.msra.mxu0 %v4466_v48  ;;  %2572 = vmatpush1.bf16.msra.mxu1 %v4469_v49  ;;  %v256_v48 = vsub.s32 4, %v5263_v8  ;;  %v4544_v49 = vld [vmem:[#allocation8 + $0x580] ss:$16 sps:$4 sm:$0xff]  }
 0x1e0   :  { %2418 = vmatprep.subr.bf16.mxu0 %v4474_v50  ;;  %2582 = vmatprep.subr.bf16.mxu1 %v4477_v26  ;;  %v4547_v50 = vld [vmem:[#allocation8 + $0x588] ss:$16 sps:$4 sm:$0xff]   ;;  %v4552_v26 = vld [vmem:[#allocation8 + $0x5a4] ss:$16 sps:$4 sm:$0xff]  }
 0x1e2   :  { %2410 = vmatmul.mubr.bf16.vlgmr.msra.gmra.mrb[8].mxu0 %v772_v52  ;;  %2574 = vmatmul.mubr.bf16.vlgmr.msra.gmra.mrb[8].mxu1 %v772_v52  ;;  %v268_v52 = vsub.s32 7, %v5263_v8 }
 0x1e3   :  { %2419 = vmatpush1.bf16.msra.mxu0 %v4472_v53  ;;  %2583 = vmatpush1.bf16.msra.mxu1 %v4475_v54  ;;  %v257_v53 = vrot.slane %v5268_v10, %v256_v48  ;;  %v4550_v54 = vld [vmem:[#allocation8 + $0x5a0] ss:$16 sps:$4 sm:$0xff]   ;;  %v4621_v48 = vld [vmem:[#allocation8 + $0x70c] ss:$16 sps:$4 sm:$0xff]  }
 0x1e4   :  { %2420 = vmatprep.subr.bf16.mxu0 %v4480_v55  ;;  %2584 = vmatprep.subr.bf16.mxu1 %v4483_v56  ;;  %v4553_v55 = vld [vmem:[#allocation8 + $0x5a8] ss:$16 sps:$4 sm:$0xff]   ;;  %v4558_v56 = vld [vmem:[#allocation8 + $0x5c4] ss:$16 sps:$4 sm:$0xff]  }
 0x1e5   :  { %2450 = vmatprep.mubr.bf16.mxu0 %v775_v57  ;;  %2614 = vmatprep.mubr.bf16.mxu1 %v775_v57  ;;  %v4561_v57 = vld [vmem:[#allocation8 + $0x5cc] ss:$16 sps:$4 sm:$0xff]  }
 0x1e7   :  { %2421 = vmatpush1.bf16.msra.mxu0 %v4478_v58  ;;  %2585 = vmatpush1.bf16.msra.mxu1 %v4481_v60  ;;  %v269_v58 = vrot.slane %v5268_v10, %v268_v52  ;;  %v715_v60 = vadd.f32 %v5283_v59, %v257_v53  ;;  %v4622_v52 = vld [vmem:[#allocation8 + $0x720] ss:$16 sps:$4 sm:$0xff]   ;;  %v4625_v53 = vld [vmem:[#allocation8 + $0x728] ss:$16 sps:$4 sm:$0xff]  }
 0x1e8   :  { %2422 = vmatprep.subr.bf16.mxu0 %v4486_v61  ;;  %2586 = vmatprep.subr.bf16.mxu1 %v4489_v62  ;;  %v4556_v61 = vld [vmem:[#allocation8 + $0x5c0] ss:$16 sps:$4 sm:$0xff]   ;;  %v4559_v62 = vld [vmem:[#allocation8 + $0x5c8] ss:$16 sps:$4 sm:$0xff]  }
 0x1eb   :  { %2423 = vmatpush1.bf16.msra.mxu0 %v4484_v63  ;;  %2587 = vmatpush1.bf16.msra.mxu1 %v4487_v1  ;;  %v4564_v63 = vld [vmem:[#allocation8 + $0x5e4] ss:$16 sps:$4 sm:$0xff]   ;;  %v4567_v1 = vld [vmem:[#allocation8 + $0x5ec] ss:$16 sps:$4 sm:$0xff]  }
 0x1ec   :  { %2424 = vmatprep.subr.bf16.mxu0 %v4492_v2  ;;  %2588 = vmatprep.subr.bf16.mxu1 %v4495_v3  ;;  %v758_v2 = vadd.f32 %v5294_v38, %v269_v58  ;;  %v766_v3 = vmax.f32 %v715_v60, 0.0  ;;  %v4636_v58 = vld [vmem:[#allocation8 + $0x764] ss:$16 sps:$4 sm:$0xff]   ;;  %v4639_v60 = vld [vmem:[#allocation8 + $0x76c] ss:$16 sps:$4 sm:$0xff]  }
 0x1ee   :  { %v769_v59 = vmax.f32 %v758_v2, 0.0  ;;  %v4640_v2 = vld [vmem:[#allocation8 + $0x780] ss:$16 sps:$4 sm:$0xff]  }
 0x1ef   :  { %2425 = vmatpush1.bf16.msra.mxu0 %v4490_v4  ;;  %2589 = vmatpush1.bf16.msra.mxu1 %v4493_v5  ;;  %v4562_v4 = vld [vmem:[#allocation8 + $0x5e0] ss:$16 sps:$4 sm:$0xff]   ;;  %v4565_v5 = vld [vmem:[#allocation8 + $0x5e8] ss:$16 sps:$4 sm:$0xff]  }
 0x1f0   :  { %2426 = vmatprep.subr.bf16.mxu0 %v4498_v7  ;;  %2590 = vmatprep.subr.bf16.mxu1 %v4501_v12  ;;  %v4570_v7 = vld [vmem:[#allocation8 + $0x604] ss:$16 sps:$4 sm:$0xff]   ;;  %v4573_v12 = vld [vmem:[#allocation8 + $0x60c] ss:$16 sps:$4 sm:$0xff]   ;;  %v777_v38 = vpack.c.bf16 %v769_v59, %v769_v59  ;;  %v4649_v59 = vld [vmem:[#allocation8 + $0x7a8] ss:$16 sps:$4 sm:$0xff]  }
 0x1f3   :  { %2427 = vmatpush1.bf16.msra.mxu0 %v4496_v13  ;;  %2591 = vmatpush1.bf16.msra.mxu1 %v4499_v14  ;;  %v774_v13 = vpack.c.bf16 %v766_v3, %v766_v3  ;;  %v4568_v14 = vld [vmem:[#allocation8 + $0x600] ss:$16 sps:$4 sm:$0xff]   ;;  %v4643_v3 = vld [vmem:[#allocation8 + $0x788] ss:$16 sps:$4 sm:$0xff]  }
 0x1f4   :  { %2428 = vmatprep.subr.bf16.mxu0 %v4504_v16  ;;  %2592 = vmatprep.subr.bf16.mxu1 %v4507_v17  ;;  %v4571_v16 = vld [vmem:[#allocation8 + $0x608] ss:$16 sps:$4 sm:$0xff]   ;;  %v4576_v17 = vld [vmem:[#allocation8 + $0x624] ss:$16 sps:$4 sm:$0xff]  }
 0x1f7   :  { %2429 = vmatpush1.bf16.msra.mxu0 %v4502_v18  ;;  %2593 = vmatpush1.bf16.msra.mxu1 %v4505_v19  ;;  %v4579_v18 = vld [vmem:[#allocation8 + $0x62c] ss:$16 sps:$4 sm:$0xff]   ;;  %v4574_v19 = vld [vmem:[#allocation8 + $0x620] ss:$16 sps:$4 sm:$0xff]  }
 0x1f8   :  { %2430 = vmatprep.subr.bf16.mxu0 %v4510_v20  ;;  %2594 = vmatprep.subr.bf16.mxu1 %v4513_v21  ;;  %v4577_v20 = vld [vmem:[#allocation8 + $0x628] ss:$16 sps:$4 sm:$0xff]   ;;  %v4582_v21 = vld [vmem:[#allocation8 + $0x644] ss:$16 sps:$4 sm:$0xff]  }
 0x1fb   :  { %2431 = vmatpush1.bf16.msra.mxu0 %v4508_v22  ;;  %2595 = vmatpush1.bf16.msra.mxu1 %v4511_v23  ;;  %v4585_v22 = vld [vmem:[#allocation8 + $0x64c] ss:$16 sps:$4 sm:$0xff]   ;;  %v4580_v23 = vld [vmem:[#allocation8 + $0x640] ss:$16 sps:$4 sm:$0xff]  }
 0x1fc   :  { %2432 = vmatprep.subr.bf16.mxu0 %v4516_v24  ;;  %2596 = vmatprep.subr.bf16.mxu1 %v4519_v6  ;;  %v4583_v24 = vld [vmem:[#allocation8 + $0x648] ss:$16 sps:$4 sm:$0xff]   ;;  %v4588_v6 = vld [vmem:[#allocation8 + $0x664] ss:$16 sps:$4 sm:$0xff]  }
 0x1ff   :  { %2433 = vmatpush1.bf16.msra.mxu0 %v4514_v27  ;;  %2597 = vmatpush1.bf16.msra.mxu1 %v4517_v28  ;;  %v4591_v27 = vld [vmem:[#allocation8 + $0x66c] ss:$16 sps:$4 sm:$0xff]   ;;  %v4586_v28 = vld [vmem:[#allocation8 + $0x660] ss:$16 sps:$4 sm:$0xff]  }
 0x200   :  { %2434 = vmatprep.subr.bf16.mxu0 %v4522_v29  ;;  %2598 = vmatprep.subr.bf16.mxu1 %v4525_v30  ;;  %v4589_v29 = vld [vmem:[#allocation8 + $0x668] ss:$16 sps:$4 sm:$0xff]   ;;  %v4594_v30 = vld [vmem:[#allocation8 + $0x684] ss:$16 sps:$4 sm:$0xff]  }
 0x203   :  { %2435 = vmatpush1.bf16.msra.mxu0 %v4520_v31  ;;  %2599 = vmatpush1.bf16.msra.mxu1 %v4523_v32  ;;  %v4597_v31 = vld [vmem:[#allocation8 + $0x68c] ss:$16 sps:$4 sm:$0xff]   ;;  %v4592_v32 = vld [vmem:[#allocation8 + $0x680] ss:$16 sps:$4 sm:$0xff]  }
 0x204   :  { %2436 = vmatprep.subr.bf16.mxu0 %v4528_v33  ;;  %2600 = vmatprep.subr.bf16.mxu1 %v4531_v34  ;;  %v4595_v33 = vld [vmem:[#allocation8 + $0x688] ss:$16 sps:$4 sm:$0xff]   ;;  %v4600_v34 = vld [vmem:[#allocation8 + $0x6a4] ss:$16 sps:$4 sm:$0xff]  }
 0x207   :  { %2437 = vmatpush1.bf16.msra.mxu0 %v4526_v36  ;;  %2601 = vmatpush1.bf16.msra.mxu1 %v4529_v37  ;;  %v4603_v36 = vld [vmem:[#allocation8 + $0x6ac] ss:$16 sps:$4 sm:$0xff]   ;;  %v4598_v37 = vld [vmem:[#allocation8 + $0x6a0] ss:$16 sps:$4 sm:$0xff]  }
 0x208   :  { %2438 = vmatprep.subr.bf16.mxu0 %v4534_v39  ;;  %2602 = vmatprep.subr.bf16.mxu1 %v4537_v40  ;;  %v4601_v39 = vld [vmem:[#allocation8 + $0x6a8] ss:$16 sps:$4 sm:$0xff]   ;;  %v4606_v40 = vld [vmem:[#allocation8 + $0x6c4] ss:$16 sps:$4 sm:$0xff]  }
 0x20b   :  { %2439 = vmatpush1.bf16.msra.mxu0 %v4532_v41  ;;  %2603 = vmatpush1.bf16.msra.mxu1 %v4535_v42  ;;  %v4609_v41 = vld [vmem:[#allocation8 + $0x6cc] ss:$16 sps:$4 sm:$0xff]   ;;  %v4604_v42 = vld [vmem:[#allocation8 + $0x6c0] ss:$16 sps:$4 sm:$0xff]  }
 0x20c   :  { %2440 = vmatprep.subr.bf16.mxu0 %v4540_v0  ;;  %2604 = vmatprep.subr.bf16.mxu1 %v4543_v43  ;;  %v4607_v0 = vld [vmem:[#allocation8 + $0x6c8] ss:$16 sps:$4 sm:$0xff]   ;;  %v4612_v43 = vld [vmem:[#allocation8 + $0x6e4] ss:$16 sps:$4 sm:$0xff]  }
 0x20f   :  { %2441 = vmatpush1.bf16.msra.mxu0 %v4538_v44  ;;  %2605 = vmatpush1.bf16.msra.mxu1 %v4541_v45  ;;  %v4615_v44 = vld [vmem:[#allocation8 + $0x6ec] ss:$16 sps:$4 sm:$0xff]   ;;  %v4610_v45 = vld [vmem:[#allocation8 + $0x6e0] ss:$16 sps:$4 sm:$0xff]  }
 0x210   :  { %2442 = vmatprep.subr.bf16.mxu0 %v4546_v46  ;;  %2606 = vmatprep.subr.bf16.mxu1 %v4549_v47  ;;  %v4613_v46 = vld [vmem:[#allocation8 + $0x6e8] ss:$16 sps:$4 sm:$0xff]   ;;  %v4618_v47 = vld [vmem:[#allocation8 + $0x704] ss:$16 sps:$4 sm:$0xff]  }
 0x213   :  { %2443 = vmatpush1.bf16.msra.mxu0 %v4544_v49  ;;  %2607 = vmatpush1.bf16.msra.mxu1 %v4547_v50  ;;  %v4616_v49 = vld [vmem:[#allocation8 + $0x700] ss:$16 sps:$4 sm:$0xff]   ;;  %v4619_v50 = vld [vmem:[#allocation8 + $0x708] ss:$16 sps:$4 sm:$0xff]  }
 0x214   :  { %2444 = vmatprep.subr.bf16.mxu0 %v4552_v26  ;;  %2608 = vmatprep.subr.bf16.mxu1 %v4555_v51  ;;  %v4624_v26 = vld [vmem:[#allocation8 + $0x724] ss:$16 sps:$4 sm:$0xff]   ;;  %v4627_v51 = vld [vmem:[#allocation8 + $0x72c] ss:$16 sps:$4 sm:$0xff]  }
 0x217   :  { %2445 = vmatpush1.bf16.msra.mxu0 %v4550_v54  ;;  %2609 = vmatpush1.bf16.msra.mxu1 %v4553_v55  ;;  %v4630_v54 = vld [vmem:[#allocation8 + $0x744] ss:$16 sps:$4 sm:$0xff]   ;;  %v4633_v55 = vld [vmem:[#allocation8 + $0x74c] ss:$16 sps:$4 sm:$0xff]  }
 0x218   :  { %2446 = vmatprep.subr.bf16.mxu0 %v4558_v56  ;;  %2610 = vmatprep.subr.bf16.mxu1 %v4561_v57  ;;  %v4628_v56 = vld [vmem:[#allocation8 + $0x740] ss:$16 sps:$4 sm:$0xff]   ;;  %v4631_v57 = vld [vmem:[#allocation8 + $0x748] ss:$16 sps:$4 sm:$0xff]  }
 0x21b   :  { %2447 = vmatpush1.bf16.msra.mxu0 %v4556_v61  ;;  %2611 = vmatpush1.bf16.msra.mxu1 %v4559_v62  ;;  %v4634_v61 = vld [vmem:[#allocation8 + $0x760] ss:$16 sps:$4 sm:$0xff]   ;;  %v4637_v62 = vld [vmem:[#allocation8 + $0x768] ss:$16 sps:$4 sm:$0xff]  }
 0x21c   :  { %2448 = vmatprep.subr.bf16.mxu0 %v4564_v63  ;;  %2612 = vmatprep.subr.bf16.mxu1 %v4567_v1  ;;  %v4642_v63 = vld [vmem:[#allocation8 + $0x784] ss:$16 sps:$4 sm:$0xff]   ;;  %v4645_v1 = vld [vmem:[#allocation8 + $0x78c] ss:$16 sps:$4 sm:$0xff]  }
 0x21f   :  { %2449 = vmatpush1.bf16.msra.mxu0 %v4562_v4  ;;  %2613 = vmatpush1.bf16.msra.mxu1 %v4565_v5  ;;  %v264_v4 = vsub.s32 6, %v5263_v8  ;;  %v4648_v5 = vld [vmem:[#allocation8 + $0x7a4] ss:$16 sps:$4 sm:$0xff]   ;;  %v4774_v8 = vld [vmem:[#allocation11 + $0x78] sm:$0xff]  }
 0x220   :  { %2459 = vmatprep.subr.bf16.mxu0 %v4570_v7  ;;  %2623 = vmatprep.subr.bf16.mxu1 %v4573_v12  ;;  %v4651_v7 = vld [vmem:[#allocation8 + $0x7ac] ss:$16 sps:$4 sm:$0xff]   ;;  %v4646_v12 = vld [vmem:[#allocation8 + $0x7a0] ss:$16 sps:$4 sm:$0xff]  }
 0x222   :  { %2451 = vmatmul.mubr.bf16.vlgmr.msra.gmra.mrb[8].mxu0 %v774_v13  ;;  %2615 = vmatmul.mubr.bf16.vlgmr.msra.gmra.mrb[8].mxu1 %v774_v13  ;;  %v265_v13 = vrot.slane %v5268_v10, %v264_v4  ;;  %v4666_v10 = vld [vmem:[#allocation10 + $0x4] ss:$8 sps:$4 sm:$0xff]  }
 0x223   :  { %2460 = vmatpush1.bf16.msra.mxu0 %v4568_v14  ;;  %2624 = vmatpush1.bf16.msra.mxu1 %v4571_v16  ;;  %v4654_v14 = vld [vmem:[#allocation8 + $0x7c4] ss:$16 sps:$4 sm:$0xff]   ;;  %v4657_v16 = vld [vmem:[#allocation8 + $0x7cc] ss:$16 sps:$4 sm:$0xff]  }
 0x224   :  { %2461 = vmatprep.subr.bf16.mxu0 %v4576_v17  ;;  %2625 = vmatprep.subr.bf16.mxu1 %v4579_v18  ;;  %v4652_v17 = vld [vmem:[#allocation8 + $0x7c0] ss:$16 sps:$4 sm:$0xff]   ;;  %v4655_v18 = vld [vmem:[#allocation8 + $0x7c8] ss:$16 sps:$4 sm:$0xff]  }
 0x225   :  { %2491 = vmatprep.mubr.bf16.mxu0 %v777_v38  ;;  %2655 = vmatprep.mubr.bf16.mxu1 %v777_v38  ;;  %v756_v38 = vadd.f32 %v5292_v35, %v265_v13  ;;  %v4667_v35 = vld [vmem:[#allocation10 + $0x10] ss:$8 sps:$4 sm:$0xff]   ;;  %v4769_v4 = vld [vmem:[#allocation11 + $0x20] sm:$0xff]  }
 0x227   :  { %2462 = vmatpush1.bf16.msra.mxu0 %v4574_v19  ;;  %2626 = vmatpush1.bf16.msra.mxu1 %v4577_v20  ;;  %v4660_v19 = vld [vmem:[#allocation8 + $0x7e4] ss:$16 sps:$4 sm:$0xff]   ;;  %v4663_v20 = vld [vmem:[#allocation8 + $0x7ec] ss:$16 sps:$4 sm:$0xff]  }
 0x228   :  { %2463 = vmatprep.subr.bf16.mxu0 %v4582_v21  ;;  %2627 = vmatprep.subr.bf16.mxu1 %v4585_v22  ;;  %v4658_v21 = vld [vmem:[#allocation8 + $0x7e0] ss:$16 sps:$4 sm:$0xff]   ;;  %v4661_v22 = vld [vmem:[#allocation8 + $0x7e8] ss:$16 sps:$4 sm:$0xff]  }
 0x22b   :  { %2464 = vmatpush1.bf16.msra.mxu0 %v4580_v23  ;;  %2628 = vmatpush1.bf16.msra.mxu1 %v4583_v24  ;;  %v768_v23 = vmax.f32 %v756_v38, 0.0  ;;  %v4664_v24 = vld [vmem:[#allocation10] ss:$8 sps:$4 sm:$0xff]  }
 0x22c   :  { %2465 = vmatprep.subr.bf16.mxu0 %v4588_v6  ;;  %2629 = vmatprep.subr.bf16.mxu1 %v4591_v27  ;;  %v4669_v27 = vld [vmem:[#allocation10 + $0x14] ss:$8 sps:$4 sm:$0xff]  }
 0x22d   :  { %v776_v6 = vpack.c.bf16 %v768_v23, %v768_v23 }
 0x22f   :  { %2466 = vmatpush1.bf16.msra.mxu0 %v4586_v28  ;;  %2630 = vmatpush1.bf16.msra.mxu1 %v4589_v29  ;;  %v4672_v28 = vld [vmem:[#allocation10 + $0x24] ss:$8 sps:$4 sm:$0xff]   ;;  %v4670_v29 = vld [vmem:[#allocation10 + $0x20] ss:$8 sps:$4 sm:$0xff]  }
 0x230   :  { %2467 = vmatprep.subr.bf16.mxu0 %v4594_v30  ;;  %2631 = vmatprep.subr.bf16.mxu1 %v4597_v31  ;;  %v4675_v30 = vld [vmem:[#allocation10 + $0x34] ss:$8 sps:$4 sm:$0xff]   ;;  %v4673_v31 = vld [vmem:[#allocation10 + $0x30] ss:$8 sps:$4 sm:$0xff]  }
 0x233   :  { %2468 = vmatpush1.bf16.msra.mxu0 %v4592_v32  ;;  %2632 = vmatpush1.bf16.msra.mxu1 %v4595_v33  ;;  %v4678_v32 = vld [vmem:[#allocation10 + $0x44] ss:$8 sps:$4 sm:$0xff]   ;;  %v4676_v33 = vld [vmem:[#allocation10 + $0x40] ss:$8 sps:$4 sm:$0xff]  }
 0x234   :  { %2469 = vmatprep.subr.bf16.mxu0 %v4600_v34  ;;  %2633 = vmatprep.subr.bf16.mxu1 %v4603_v36  ;;  %v4681_v34 = vld [vmem:[#allocation10 + $0x54] ss:$8 sps:$4 sm:$0xff]   ;;  %v4679_v36 = vld [vmem:[#allocation10 + $0x50] ss:$8 sps:$4 sm:$0xff]  }
 0x237   :  { %2470 = vmatpush1.bf16.msra.mxu0 %v4598_v37  ;;  %2634 = vmatpush1.bf16.msra.mxu1 %v4601_v39  ;;  %v4684_v37 = vld [vmem:[#allocation10 + $0x64] ss:$8 sps:$4 sm:$0xff]   ;;  %v4682_v39 = vld [vmem:[#allocation10 + $0x60] ss:$8 sps:$4 sm:$0xff]  }
 0x238   :  { %2471 = vmatprep.subr.bf16.mxu0 %v4606_v40  ;;  %2635 = vmatprep.subr.bf16.mxu1 %v4609_v41  ;;  %v4687_v40 = vld [vmem:[#allocation10 + $0x74] ss:$8 sps:$4 sm:$0xff]   ;;  %v4685_v41 = vld [vmem:[#allocation10 + $0x70] ss:$8 sps:$4 sm:$0xff]  }
 0x23b   :  { %2472 = vmatpush1.bf16.msra.mxu0 %v4604_v42  ;;  %2636 = vmatpush1.bf16.msra.mxu1 %v4607_v0  ;;  %v4690_v42 = vld [vmem:[#allocation10 + $0x84] ss:$8 sps:$4 sm:$0xff]   ;;  %v4688_v0 = vld [vmem:[#allocation10 + $0x80] ss:$8 sps:$4 sm:$0xff]  }
 0x23c   :  { %2473 = vmatprep.subr.bf16.mxu0 %v4612_v43  ;;  %2637 = vmatprep.subr.bf16.mxu1 %v4615_v44  ;;  %v4693_v43 = vld [vmem:[#allocation10 + $0x94] ss:$8 sps:$4 sm:$0xff]   ;;  %v4691_v44 = vld [vmem:[#allocation10 + $0x90] ss:$8 sps:$4 sm:$0xff]  }
 0x23f   :  { %2474 = vmatpush1.bf16.msra.mxu0 %v4610_v45  ;;  %2638 = vmatpush1.bf16.msra.mxu1 %v4613_v46  ;;  %v4696_v45 = vld [vmem:[#allocation10 + $0xa4] ss:$8 sps:$4 sm:$0xff]   ;;  %v4694_v46 = vld [vmem:[#allocation10 + $0xa0] ss:$8 sps:$4 sm:$0xff]  }
 0x240   :  { %2475 = vmatprep.subr.bf16.mxu0 %v4618_v47  ;;  %2639 = vmatprep.subr.bf16.mxu1 %v4621_v48  ;;  %v4699_v47 = vld [vmem:[#allocation10 + $0xb4] ss:$8 sps:$4 sm:$0xff]   ;;  %v4697_v48 = vld [vmem:[#allocation10 + $0xb0] ss:$8 sps:$4 sm:$0xff]  }
 0x243   :  { %2476 = vmatpush1.bf16.msra.mxu0 %v4616_v49  ;;  %2640 = vmatpush1.bf16.msra.mxu1 %v4619_v50  ;;  %v4702_v49 = vld [vmem:[#allocation10 + $0xc4] ss:$8 sps:$4 sm:$0xff]   ;;  %v4700_v50 = vld [vmem:[#allocation10 + $0xc0] ss:$8 sps:$4 sm:$0xff]  }
 0x244   :  { %2477 = vmatprep.subr.bf16.mxu0 %v4624_v26  ;;  %2641 = vmatprep.subr.bf16.mxu1 %v4627_v51  ;;  %v4705_v26 = vld [vmem:[#allocation10 + $0xd4] ss:$8 sps:$4 sm:$0xff]   ;;  %v4703_v51 = vld [vmem:[#allocation10 + $0xd0] ss:$8 sps:$4 sm:$0xff]  }
 0x247   :  { %2478 = vmatpush1.bf16.msra.mxu0 %v4622_v52  ;;  %2642 = vmatpush1.bf16.msra.mxu1 %v4625_v53  ;;  %v4708_v52 = vld [vmem:[#allocation10 + $0xe4] ss:$8 sps:$4 sm:$0xff]   ;;  %v4706_v53 = vld [vmem:[#allocation10 + $0xe0] ss:$8 sps:$4 sm:$0xff]  }
 0x248   :  { %2479 = vmatprep.subr.bf16.mxu0 %v4630_v54  ;;  %2643 = vmatprep.subr.bf16.mxu1 %v4633_v55  ;;  %v4711_v54 = vld [vmem:[#allocation10 + $0xf4] ss:$8 sps:$4 sm:$0xff]   ;;  %v4709_v55 = vld [vmem:[#allocation10 + $0xf0] ss:$8 sps:$4 sm:$0xff]  }
 0x24b   :  { %2480 = vmatpush1.bf16.msra.mxu0 %v4628_v56  ;;  %2644 = vmatpush1.bf16.msra.mxu1 %v4631_v57  ;;  %v4714_v56 = vld [vmem:[#allocation10 + $0x104] ss:$8 sps:$4 sm:$0xff]  }
 0x24c   :  { %2481 = vmatprep.subr.bf16.mxu0 %v4636_v58  ;;  %2645 = vmatprep.subr.bf16.mxu1 %v4639_v60  ;;  %v4760_v57 = vld [vmem:[#allocation11 + $0x40] sm:$0xff]   ;;  %v4762_v60 = vld [vmem:[#allocation11 + $0x48] sm:$0xff]  }
 0x24d   :  { %v4761_v58 = vld [vmem:[#allocation11] sm:$0xff]  }
 0x24f   :  { %2482 = vmatpush1.bf16.msra.mxu0 %v4634_v61  ;;  %2646 = vmatpush1.bf16.msra.mxu1 %v4637_v62  ;;  %v4763_v61 = vld [vmem:[#allocation11 + $0x8] sm:$0xff]   ;;  %v4764_v62 = vld [vmem:[#allocation11 + $0x50] sm:$0xff]  }
 0x250   :  { %2483 = vmatprep.subr.bf16.mxu0 %v4642_v63  ;;  %2647 = vmatprep.subr.bf16.mxu1 %v4645_v1  ;;  %v4765_v63 = vld [vmem:[#allocation11 + $0x10] sm:$0xff]   ;;  %v4766_v1 = vld [vmem:[#allocation11 + $0x58] sm:$0xff]  }
 0x253   :  { %2484 = vmatpush1.bf16.msra.mxu0 %v4640_v2  ;;  %2648 = vmatpush1.bf16.msra.mxu1 %v4643_v3  ;;  %v4767_v2 = vld [vmem:[#allocation11 + $0x18] sm:$0xff]   ;;  %v4768_v3 = vld [vmem:[#allocation11 + $0x60] sm:$0xff]  }
 0x254   :  { %2485 = vmatprep.subr.bf16.mxu0 %v4648_v5  ;;  %2649 = vmatprep.subr.bf16.mxu1 %v4651_v7  ;;  %v4770_v5 = vld [vmem:[#allocation11 + $0x68] sm:$0xff]  }
 0x255   :  { %v4771_v7 = vld [vmem:[#allocation11 + $0x28] sm:$0xff]  }
 0x257   :  { %2486 = vmatpush1.bf16.msra.mxu0 %v4646_v12  ;;  %2650 = vmatpush1.bf16.msra.mxu1 %v4649_v59  ;;  %v5311_v12 = vld [vmem:[%s5389_s4] sm:$0xf] }
 0x258   :  { %2487 = vmatprep.subr.bf16.mxu0 %v4654_v14  ;;  %2651 = vmatprep.subr.bf16.mxu1 %v4657_v16  ;;  %v1039_v59 = vrot.slane %v5311_v12, %v5266_v9  ;;  %v1043_v13 = vrot.slane %v5311_v12, %v5271_v11  ;;  %v1051_v14 = vrot.slane %v5311_v12, %v252_v15 }
 0x25b   :  { %2488 = vmatpush1.bf16.msra.mxu0 %v4652_v17  ;;  %2652 = vmatpush1.bf16.msra.mxu1 %v4655_v18 }
 0x25c   :  { %2489 = vmatprep.subr.bf16.mxu0 %v4660_v19  ;;  %2653 = vmatprep.subr.bf16.mxu1 %v4663_v20 }
 0x25f   :  { %2490 = vmatpush1.bf16.msra.mxu0 %v4658_v21  ;;  %2654 = vmatpush1.bf16.msra.mxu1 %v4661_v22 }
 0x260   :  { %3068 = vmatprep.subr.bf16.mxu0 %v4666_v10  ;;  %4116 = vmatprep.subr.bf16.mxu1 %v4760_v57  ;;  %v1047_v57 = vrot.slane %v5311_v12, %v248_v25  ;;  %v4775_v25 = vld [vmem:[#allocation11 + $0x38] sm:$0xff]  }
 0x262   :  { %2492 = vmatmul.mubr.bf16.vlgmr.msra.gmra.mrb[8].mxu0 %v776_v6  ;;  %2656 = vmatmul.mubr.bf16.vlgmr.msra.gmra.mrb[8].mxu1 %v776_v6 }
 0x263   :  { %3069 = vmatpush1.bf16.msra.mxu0 %v4664_v24  ;;  %4117 = vmatpush3.bf16.msra.mxu1 %v4761_v58  ;;  %v4756_v58 = vld [vmem:[#allocation10 + $0x1e4] ss:$8 sps:$4 sm:$0xff]  }
 0x264   :  { %3070 = vmatprep.subr.bf16.mxu0 %v4669_v27  ;;  %4118 = vmatprep.subr.bf16.mxu1 %v4762_v60  ;;  %v4754_v60 = vld [vmem:[#allocation10 + $0x1e0] ss:$8 sps:$4 sm:$0xff]  }
 0x267   :  { %3071 = vmatpush1.bf16.msra.mxu0 %v4667_v35  ;;  %4119 = vmatpush3.bf16.msra.mxu1 %v4763_v61 }
 0x268   :  { %3072 = vmatprep.subr.bf16.mxu0 %v4672_v28  ;;  %4120 = vmatprep.subr.bf16.mxu1 %v4764_v62  ;;  %v4759_v62 = vld [vmem:[#allocation10 + $0x1f4] ss:$8 sps:$4 sm:$0xff]  }
 0x26b   :  { %3073 = vmatpush1.bf16.msra.mxu0 %v4670_v29  ;;  %4121 = vmatpush3.bf16.msra.mxu1 %v4765_v63  ;;  %v4712_v29 = vld [vmem:[#allocation10 + $0x100] ss:$8 sps:$4 sm:$0xff]   ;;  %v4757_v63 = vld [vmem:[#allocation10 + $0x1f0] ss:$8 sps:$4 sm:$0xff]  }
 0x26c   :  { %3074 = vmatprep.subr.bf16.mxu0 %v4675_v30  ;;  %4122 = vmatprep.subr.bf16.mxu1 %v4766_v1 }
 0x26f   :  { %3075 = vmatpush1.bf16.msra.mxu0 %v4673_v31  ;;  %4123 = vmatpush3.bf16.msra.mxu1 %v4767_v2  ;;  %v4717_v31 = vld [vmem:[#allocation10 + $0x114] ss:$8 sps:$4 sm:$0xff]  }
 0x270   :  { %3076 = vmatprep.subr.bf16.mxu0 %v4678_v32  ;;  %4124 = vmatprep.subr.bf16.mxu1 %v4768_v3  ;;  %v4715_v32 = vld [vmem:[#allocation10 + $0x110] ss:$8 sps:$4 sm:$0xff]  }
 0x271   :  { %v4772_v3 = vld [vmem:[#allocation11 + $0x70] sm:$0xff]  }
 0x273   :  { %3077 = vmatpush1.bf16.msra.mxu0 %v4676_v33  ;;  %4125 = vmatpush3.bf16.msra.mxu1 %v4769_v4  ;;  %v4720_v33 = vld [vmem:[#allocation10 + $0x124] ss:$8 sps:$4 sm:$0xff]   ;;  %v4773_v4 = vld [vmem:[#allocation11 + $0x30] sm:$0xff]  }
 0x274   :  { %3078 = vmatprep.subr.bf16.mxu0 %v4681_v34  ;;  %4126 = vmatprep.subr.bf16.mxu1 %v4770_v5  ;;  %v4718_v34 = vld [vmem:[#allocation10 + $0x120] ss:$8 sps:$4 sm:$0xff]   ;;  %v5050_v5 = vmov 0.0  }
 0x277   :  { %3079 = vmatpush1.bf16.msra.mxu0 %v4679_v36  ;;  %4127 = vmatpush3.bf16.msra.mxu1 %v4771_v7  ;;  %v4723_v36 = vld [vmem:[#allocation10 + $0x134] ss:$8 sps:$4 sm:$0xff]   ;;  %v2736_v7 = vld [vmem:[%s5391_s6] sm:$0x3] }
 0x278   :  { %3080 = vmatprep.subr.bf16.mxu0 %v4684_v37  ;;  %v4721_v37 = vld [vmem:[#allocation10 + $0x130] ss:$8 sps:$4 sm:$0xff]   ;;  %4128 = vmatprep.subr.bf16.mxu1 %v4772_v3  ;;  %v2741_v12 = vrot.slane %v2736_v7, %v5266_v9 }
 0x279   :  { %v4778_v9 = vld [vmem:[#allocation13 + $0x10] sm:$0xff]  }
 0x27b   :  { %3081 = vmatpush1.bf16.msra.mxu0 %v4682_v39  ;;  %v4726_v39 = vld [vmem:[#allocation10 + $0x144] ss:$8 sps:$4 sm:$0xff]   ;;  %4129 = vmatpush3.bf16.msra.mxu1 %v4773_v4 }
 0x27c   :  { %3082 = vmatprep.subr.bf16.mxu0 %v4687_v40  ;;  %v4724_v40 = vld [vmem:[#allocation10 + $0x140] ss:$8 sps:$4 sm:$0xff]   ;;  %4130 = vmatprep.subr.bf16.mxu1 %v4774_v8 }
 0x27f   :  { %3083 = vmatpush1.bf16.msra.mxu0 %v4685_v41  ;;  %v4729_v41 = vld [vmem:[#allocation10 + $0x154] ss:$8 sps:$4 sm:$0xff]   ;;  %4131 = vmatpush3.bf16.msra.mxu1 %v4775_v25  ;;  %v4107_v25 = vld [vmem:[%s5399_s14] ss:$0 sm:$0xff] }
 0x280   :  { %3084 = vmatprep.subr.bf16.mxu0 %v4690_v42  ;;  %v4727_v42 = vld [vmem:[#allocation10 + $0x150] ss:$8 sps:$4 sm:$0xff]   ;;  %4165 = vmatprep.subr.bf16.mxu1 %v5050_v5 }
 0x283   :  { %3085 = vmatpush1.bf16.msra.mxu0 %v4688_v0  ;;  %v4732_v0 = vld [vmem:[#allocation10 + $0x164] ss:$8 sps:$4 sm:$0xff]  }
 0x284   :  { %3086 = vmatprep.subr.bf16.mxu0 %v4693_v43  ;;  %v4730_v43 = vld [vmem:[#allocation10 + $0x160] ss:$8 sps:$4 sm:$0xff]  }
 0x287   :  { %3087 = vmatpush1.bf16.msra.mxu0 %v4691_v44  ;;  %v4735_v44 = vld [vmem:[#allocation10 + $0x174] ss:$8 sps:$4 sm:$0xff]  }
 0x288   :  { %3088 = vmatprep.subr.bf16.mxu0 %v4696_v45  ;;  %v4733_v45 = vld [vmem:[#allocation10 + $0x170] ss:$8 sps:$4 sm:$0xff]  }
 0x28b   :  { %3089 = vmatpush1.bf16.msra.mxu0 %v4694_v46  ;;  %v4738_v46 = vld [vmem:[#allocation10 + $0x184] ss:$8 sps:$4 sm:$0xff]  }
 0x28c   :  { %3090 = vmatprep.subr.bf16.mxu0 %v4699_v47  ;;  %v4736_v47 = vld [vmem:[#allocation10 + $0x180] ss:$8 sps:$4 sm:$0xff]  }
 0x28f   :  { %3091 = vmatpush1.bf16.msra.mxu0 %v4697_v48  ;;  %v4741_v48 = vld [vmem:[#allocation10 + $0x194] ss:$8 sps:$4 sm:$0xff]  }
 0x290   :  { %3092 = vmatprep.subr.bf16.mxu0 %v4702_v49  ;;  %v4739_v49 = vld [vmem:[#allocation10 + $0x190] ss:$8 sps:$4 sm:$0xff]  }
 0x293   :  { %3093 = vmatpush1.bf16.msra.mxu0 %v4700_v50  ;;  %v4744_v50 = vld [vmem:[#allocation10 + $0x1a4] ss:$8 sps:$4 sm:$0xff]  }
 0x294   :  { %3094 = vmatprep.subr.bf16.mxu0 %v4705_v26  ;;  %v4742_v26 = vld [vmem:[#allocation10 + $0x1a0] ss:$8 sps:$4 sm:$0xff]  }
 0x297   :  { %3095 = vmatpush1.bf16.msra.mxu0 %v4703_v51  ;;  %v4747_v51 = vld [vmem:[#allocation10 + $0x1b4] ss:$8 sps:$4 sm:$0xff]  }
 0x298   :  { %3096 = vmatprep.subr.bf16.mxu0 %v4708_v52  ;;  %v4745_v52 = vld [vmem:[#allocation10 + $0x1b0] ss:$8 sps:$4 sm:$0xff]  }
 0x29b   :  { %3097 = vmatpush1.bf16.msra.mxu0 %v4706_v53  ;;  %v4750_v53 = vld [vmem:[#allocation10 + $0x1c4] ss:$8 sps:$4 sm:$0xff]  }
 0x29c   :  { %3098 = vmatprep.subr.bf16.mxu0 %v4711_v54  ;;  %v4748_v54 = vld [vmem:[#allocation10 + $0x1c0] ss:$8 sps:$4 sm:$0xff]  }
 0x29f   :  { %3099 = vmatpush1.bf16.msra.mxu0 %v4709_v55  ;;  %v4753_v55 = vld [vmem:[#allocation10 + $0x1d4] ss:$8 sps:$4 sm:$0xff]  }
 0x2a0   :  { %3109 = vmatprep.subr.bf16.mxu0 %v4714_v56  ;;  %v4751_v56 = vld [vmem:[#allocation10 + $0x1d0] ss:$8 sps:$4 sm:$0xff]  }
 0x335   :  { %v2493_v16 = vpop.f32.mrb[8].mxu0  ;;  %v5320_v17 = vpop.f32.mrb[8].mxu1 }
 0x336   :  { %v4225_v18 = vadd.f32 %v2493_v16, %v1039_v59  ;;  %v2495_v38 = vpop.f32.mrb[9].mxu0  ;;  %v2659_v19 = vpop.f32.mrb[9].mxu1  ;;  %v4227_v61 = vadd.f32 %v5320_v17, %v1047_v57  ;;  %v2745_v59 = vrot.slane %v2736_v7, %v5271_v11  ;;  %v4779_v11 = vld [vmem:[#allocation13 + $0x18] sm:$0xff]   ;;  %v4797_v57 = vld [vmem:[#allocation16 + $0x28] sm:$0xff]  }
 0x337   :  { %v4226_v20 = vadd.f32 %v2495_v38, %v1043_v13  ;;  %v4228_v21 = vadd.f32 %v2659_v19, %v1051_v14  ;;  %v2497_v22 = vpop.f32.mrb[10].mxu0  ;;  %v2661_v23 = vpop.f32.mrb[10].mxu1 }
 0x338   :  { %v2664_v10 = vmax.f32 %v4225_v18, 0.0  ;;  %v2498_v24 = vpop.f32.mrb[11].mxu0  ;;  %v2662_v6 = vpop.f32.mrb[11].mxu1  ;;  %v2666_v1 = vmax.f32 %v4227_v61, 0.0  ;;  %v4776_v22 = vld [vmem:[#allocation13] sm:$0xff]  }
 0x339   :  { %v2665_v27 = vmax.f32 %v4226_v20, 0.0  ;;  %v2667_v35 = vmax.f32 %v4228_v21, 0.0  ;;  %v4780_v24 = vld [vmem:[#allocation13 + $0x20] sm:$0xff]   ;;  %v4781_v6 = vld [vmem:[#allocation13 + $0x28] sm:$0xff]   ;;  %v4098_v61 = vld [vmem:[%s5397_s12] ss:$0 sm:$0xff] }
 0x33a   :  { %v2668_v30 = vpack.c.bf16 %v2664_v10, %v2664_v10  ;;  %v2670_v2 = vpack.c.bf16 %v2666_v1, %v2666_v1  ;;  %v4777_v10 = vld [vmem:[#allocation13 + $0x8] sm:$0xff]   ;;  %s4998_s12 = scalar_lea.vmem %s3676_s28, 128 }
 0x33b   :  { %v2669_v28 = vpack.c.bf16 %v2665_v27, %v2665_v27  ;;  %v2671_v15 = vpack.c.bf16 %v2667_v35, %v2667_v35  ;;  %v4782_v27 = vld [vmem:[#allocation13 + $0x30] sm:$0xff]   ;;  %v4783_v35 = vld [vmem:[#allocation13 + $0x38] sm:$0xff]   ;;  %p4999_p2 = scmp.ne.s32.totalorder %s3676_s28, %s4998_s12  ;;  %p5004_p4 = scmp.lt.s32.totalorder %s4998_s12, %s4998_s12 }
 0x33d   :  { %3100 = vmatprep.mubr.bf16.mxu0 %v2669_v28  ;;  %p5005_p5 = por %p5004_p4, %p5003_p3 }
 0x33e   :  { %3101 = vmatmul.mubr.bf16.vlgmr.msra.gmra.mrb[12].mxu0 %v2668_v30 }
 0x33f   :  { %3110 = vmatpush1.bf16.msra.mxu0 %v4712_v29  ;;  %3141 = vmatprep.mubr.bf16.mxu0 %v2671_v15  ;;  %v4072_v29 = vld [vmem:[%s5393_s8] ss:$0 sm:$0xff]  ;;  %p5006_p6 = pnand %p5005_p5, %p4999_p2 }
 0x340   :  { %3111 = vmatprep.subr.bf16.mxu0 %v4717_v31 }
 0x343   :  { %3112 = vmatpush1.bf16.msra.mxu0 %v4715_v32 }
 0x344   :  { %3113 = vmatprep.subr.bf16.mxu0 %v4720_v33 }
 0x347   :  { %3114 = vmatpush1.bf16.msra.mxu0 %v4718_v34 }
 0x348   :  { %3115 = vmatprep.subr.bf16.mxu0 %v4723_v36  ;;  %v4784_v36 = vld [vmem:[#allocation14] sm:$0xff]  }
 0x34b   :  { %3116 = vmatpush1.bf16.msra.mxu0 %v4721_v37 }
 0x34c   :  { %3117 = vmatprep.subr.bf16.mxu0 %v4726_v39  ;;  %v4785_v39 = vld [vmem:[#allocation14 + $0x8] sm:$0xff]  }
 0x34f   :  { %3118 = vmatpush1.bf16.msra.mxu0 %v4724_v40  ;;  %v4786_v40 = vld [vmem:[#allocation14 + $0x10] sm:$0xff]  }
 0x350   :  { %3119 = vmatprep.subr.bf16.mxu0 %v4729_v41  ;;  %v4787_v41 = vld [vmem:[#allocation14 + $0x18] sm:$0xff]  }
 0x353   :  { %3120 = vmatpush1.bf16.msra.mxu0 %v4727_v42  ;;  %v4788_v42 = vld [vmem:[#allocation14 + $0x20] sm:$0xff]  }
 0x354   :  { %3121 = vmatprep.subr.bf16.mxu0 %v4732_v0  ;;  %v4789_v0 = vld [vmem:[#allocation14 + $0x28] sm:$0xff]  }
 0x357   :  { %3122 = vmatpush1.bf16.msra.mxu0 %v4730_v43  ;;  %v4790_v43 = vld [vmem:[#allocation14 + $0x30] sm:$0xff]  }
 0x358   :  { %3123 = vmatprep.subr.bf16.mxu0 %v4735_v44  ;;  %v4791_v44 = vld [vmem:[#allocation14 + $0x38] sm:$0xff]  }
 0x35b   :  { %3124 = vmatpush1.bf16.msra.mxu0 %v4733_v45  ;;  %v4089_v45 = vld [vmem:[%s5395_s10] ss:$0 sm:$0xff] }
 0x35c   :  { %3125 = vmatprep.subr.bf16.mxu0 %v4738_v46 }
 0x35f   :  { %3126 = vmatpush1.bf16.msra.mxu0 %v4736_v47 }
 0x360   :  { %3127 = vmatprep.subr.bf16.mxu0 %v4741_v48 }
 0x363   :  { %3128 = vmatpush1.bf16.msra.mxu0 %v4739_v49 }
 0x364   :  { %3129 = vmatprep.subr.bf16.mxu0 %v4744_v50 }
 0x367   :  { %3130 = vmatpush1.bf16.msra.mxu0 %v4742_v26 }
 0x368   :  { %3131 = vmatprep.subr.bf16.mxu0 %v4747_v51  ;;  %v4792_v51 = vld [vmem:[#allocation16] sm:$0xff]  }
 0x36b   :  { %3132 = vmatpush1.bf16.msra.mxu0 %v4745_v52 }
 0x36c   :  { %3133 = vmatprep.subr.bf16.mxu0 %v4750_v53  ;;  %v4793_v53 = vld [vmem:[#allocation16 + $0x8] sm:$0xff]  }
 0x36f   :  { %3134 = vmatpush1.bf16.msra.mxu0 %v4748_v54  ;;  %v4794_v54 = vld [vmem:[#allocation16 + $0x10] sm:$0xff]  }
 0x370   :  { %3135 = vmatprep.subr.bf16.mxu0 %v4753_v55  ;;  %v4795_v55 = vld [vmem:[#allocation16 + $0x18] sm:$0xff]  }
 0x373   :  { %3136 = vmatpush1.bf16.msra.mxu0 %v4751_v56  ;;  %v4796_v56 = vld [vmem:[#allocation16 + $0x20] sm:$0xff]  }
 0x374   :  { %3137 = vmatprep.subr.bf16.mxu0 %v4756_v58  ;;  %v4798_v58 = vld [vmem:[#allocation16 + $0x30] sm:$0xff]  }
 0x377   :  { %3138 = vmatpush1.bf16.msra.mxu0 %v4754_v60  ;;  %v4799_v60 = vld [vmem:[#allocation16 + $0x38] sm:$0xff]  }
 0x378   :  { %3139 = vmatprep.subr.bf16.mxu0 %v4759_v62 }
 0x37b   :  { %3140 = vmatpush1.bf16.msra.mxu0 %v4757_v63 }
 0x37e   :  { %3142 = vmatmul.mubr.bf16.vlgmr.msra.gmra.mrb[12].mxu0 %v2670_v2 }
 0x451   :  { %v3143_v13 = vpop.f32.mrb[12].mxu0 }
 0x452   :  { %v4229_v14 = vadd.f32 %v3143_v13, %v2741_v12  ;;  %v3145_v16 = vpop.f32.mrb[13].mxu0 }
 0x453   :  { %v4230_v17 = vadd.f32 %v3145_v16, %v2745_v59  ;;  %v3147_v18 = vpop.f32.mrb[14].mxu0 }
 0x454   :  { %v3150_v38 = vmax.f32 %v4229_v14, 0.0  ;;  %v3148_v19 = vpop.f32.mrb[15].mxu0 }
 0x455   :  { %v3151_v20 = vmax.f32 %v4230_v17, 0.0 }
 0x456   :  { %v3152_v23 = vpack.c.bf16 %v3150_v38, %v3150_v38 }
 0x457   :  { %v3153_v21 = vpack.c.bf16 %v3151_v20, %v3151_v20 }
 0x459   :  { %3321 = vmatprep.mubr.bf16.mxu1 %v3153_v21 }
 0x45a   :  { %3322 = vmatmul.mubr.bf16.vlgmr.msra.gmra.mrb[12].mxu1 %v3152_v23 }
 0x45b   :  { %4166 = vmatpush3.bf16.msra.mxu1 %v4776_v22  ;;  %4181 = vmatprep.mubr.msk.bf16.mxu1 %vm5051_vm0, %v5050_v5 }
 0x45c   :  { %4167 = vmatprep.subr.bf16.mxu1 %v5050_v5 }
 0x45f   :  { %4168 = vmatpush3.bf16.msra.mxu1 %v4777_v10 }
 0x460   :  { %4169 = vmatprep.subr.bf16.mxu1 %v5050_v5 }
 0x463   :  { %4170 = vmatpush3.bf16.msra.mxu1 %v4778_v9 }
 0x464   :  { %4171 = vmatprep.subr.bf16.mxu1 %v5050_v5 }
 0x467   :  { %4172 = vmatpush3.bf16.msra.mxu1 %v4779_v11 }
 0x468   :  { %4173 = vmatprep.subr.bf16.mxu1 %v5050_v5 }
 0x46b   :  { %4174 = vmatpush3.bf16.msra.mxu1 %v4780_v24 }
 0x46c   :  { %4175 = vmatprep.subr.bf16.mxu1 %v5050_v5 }
 0x46f   :  { %4176 = vmatpush3.bf16.msra.mxu1 %v4781_v6 }
 0x470   :  { %4177 = vmatprep.subr.bf16.mxu1 %v5050_v5 }
 0x473   :  { %4178 = vmatpush3.bf16.msra.mxu1 %v4782_v27 }
 0x474   :  { %4179 = vmatprep.subr.bf16.mxu1 %v5050_v5 }
 0x477   :  { %4180 = vmatpush3.bf16.msra.mxu1 %v4783_v35 }
 0x478   :  { %4185 = vmatprep.subr.bf16.mxu1 %v5050_v5 }
 0x52d   :  { %v4132_v28 = vpop.f32.mrb[12].mxu1 }
 0x52e   :  { %v4133_v30 = vpop.f32.mrb[13].mxu1 }
 0x52f   :  { %v4134_v31 = vadd.f32 %v4133_v30, %v4132_v28  ;;  %v4135_v15 = vpop.f32.mrb[14].mxu1 }
 0x530   :  { %v4136_v32 = vpop.f32.mrb[15].mxu1 }
 0x531   :  { %v3324_v33 = vadd.f32 %v4134_v31, %v4072_v29 }
 0x533   :  { %v3329_v34 = vmax.f32 %v3324_v33, 0.0 }
 0x535   :  { %v3330_v37 = vpack.c.bf16 %v3329_v34, %v3329_v34 }
 0x537   :  { %4182 = vmatmul.mubr.bf16.vlgmr.msra.gmra.mrb[16].mxu1 %v3330_v37 }
 0x538   :  { %4186 = vmatpush3.bf16.msra.mxu1 %v4784_v36  ;;  %4201 = vmatprep.mubr.msk.bf16.mxu1 %vm5051_vm0, %v5050_v5 }
 0x539   :  { %4187 = vmatprep.subr.bf16.mxu1 %v5050_v5 }
 0x53c   :  { %4188 = vmatpush3.bf16.msra.mxu1 %v4785_v39 }
 0x53d   :  { %4189 = vmatprep.subr.bf16.mxu1 %v5050_v5 }
 0x540   :  { %4190 = vmatpush3.bf16.msra.mxu1 %v4786_v40 }
 0x541   :  { %4191 = vmatprep.subr.bf16.mxu1 %v5050_v5 }
 0x544   :  { %4192 = vmatpush3.bf16.msra.mxu1 %v4787_v41 }
 0x545   :  { %4193 = vmatprep.subr.bf16.mxu1 %v5050_v5 }
 0x548   :  { %4194 = vmatpush3.bf16.msra.mxu1 %v4788_v42 }
 0x549   :  { %4195 = vmatprep.subr.bf16.mxu1 %v5050_v5 }
 0x54c   :  { %4196 = vmatpush3.bf16.msra.mxu1 %v4789_v0 }
 0x54d   :  { %4197 = vmatprep.subr.bf16.mxu1 %v5050_v5 }
 0x550   :  { %4198 = vmatpush3.bf16.msra.mxu1 %v4790_v43 }
 0x551   :  { %4199 = vmatprep.subr.bf16.mxu1 %v5050_v5 }
 0x554   :  { %4200 = vmatpush3.bf16.msra.mxu1 %v4791_v44 }
 0x555   :  { %4205 = vmatprep.subr.bf16.mxu1 %v5050_v5 }
 0x60a   :  { %v3436_v46 = vpop.f32.mrb[16].mxu1 }
 0x60b   :  { %v3437_v47 = vadd.f32 %v4089_v45, %v3436_v46  ;;  %v4183_v48 = vpop.f32.mrb[17].mxu1 }
 0x60c   :  { %v3439_v49 = vpop.f32.mrb[18].mxu1 }
 0x60d   :  { %v3442_v50 = vmax.f32 %v3437_v47, 0.0  ;;  %v4184_v26 = vpop.f32.mrb[19].mxu1 }
 0x60f   :  { %v3443_v52 = vpack.c.bf16 %v3442_v50, %v3442_v50 }
 0x611   :  { %4202 = vmatmul.mubr.bf16.vlgmr.msra.gmra.mrb[20].mxu1 %v3443_v52 }
 0x612   :  { %4206 = vmatpush3.bf16.msra.mxu1 %v4792_v51  ;;  %4221 = vmatprep.mubr.msk.bf16.mxu1 %vm5051_vm0, %v5050_v5 }
 0x613   :  { %4207 = vmatprep.subr.bf16.mxu1 %v5050_v5 }
 0x616   :  { %4208 = vmatpush3.bf16.msra.mxu1 %v4793_v53 }
 0x617   :  { %4209 = vmatprep.subr.bf16.mxu1 %v5050_v5 }
 0x61a   :  { %4210 = vmatpush3.bf16.msra.mxu1 %v4794_v54 }
 0x61b   :  { %4211 = vmatprep.subr.bf16.mxu1 %v5050_v5 }
 0x61e   :  { %4212 = vmatpush3.bf16.msra.mxu1 %v4795_v55 }
 0x61f   :  { %4213 = vmatprep.subr.bf16.mxu1 %v5050_v5 }
 0x622   :  { %4214 = vmatpush3.bf16.msra.mxu1 %v4796_v56 }
 0x623   :  { %4215 = vmatprep.subr.bf16.mxu1 %v5050_v5 }
 0x626   :  { %4216 = vmatpush3.bf16.msra.mxu1 %v4797_v57 }
 0x627   :  { %4217 = vmatprep.subr.bf16.mxu1 %v5050_v5 }
 0x62a   :  { %4218 = vmatpush3.bf16.msra.mxu1 %v4798_v58 }
 0x62b   :  { %4219 = vmatprep.subr.bf16.mxu1 %v5050_v5 }
 0x62e   :  { %4220 = vmatpush3.bf16.msra.mxu1 %v4799_v60 }
 0x6e4   :  { %v3549_v62 = vpop.f32.mrb[20].mxu1 }
 0x6e5   :  { %v3550_v63 = vadd.f32 %v4098_v61, %v3549_v62  ;;  %v4203_v1 = vpop.f32.mrb[21].mxu1 }
 0x6e6   :  { %v3552_v2 = vpop.f32.mrb[22].mxu1 }
 0x6e7   :  { %v3555_v3 = vmax.f32 %v3550_v63, 0.0  ;;  %v4204_v4 = vpop.f32.mrb[23].mxu1 }
 0x6e9   :  { %v3556_v8 = vpack.c.bf16 %v3555_v3, %v3555_v3 }
 0x6eb   :  { %4222 = vmatmul.mubr.bf16.vlgmr.msra.gmra.mrb[24].mxu1 %v3556_v8 }
 0x7be   :  { %v3662_v5 = vpop.f32.mrb[24].mxu1 }
 0x7bf   :  { %v3663_v7 = vadd.f32 %v4107_v25, %v3662_v5  ;;  %v4223_v12 = vpop.f32.mrb[25].mxu1 }
 0x7c0   :  { %v3665_v59 = vpop.f32.mrb[26].mxu1 }
 0x7c1   :  { %3668 = vst [vmem:[#allocation17] sm:$0xff] %v3663_v7  ;;  %v4224_v13 = vpop.f32.mrb[27].mxu1 }
 0x7c2   :  { %5009 = shalt.err (!%p5006_p6)
}
 0x7c3   :  { %s5010_s14 = scalar_lea.hbm %s5400_s15, 128 }
 0x7c4   :  { %p5011_p7 = scmp.ne.s32.totalorder %s5400_s15, %s5010_s14  ;;  %p5014_p8 = scmp.lt.u32.totalorder %s5010_s14, %s5400_s15 }
 0x7c6   :  { %p5016_p9 = pnand %p5014_p8, %p5011_p7 }
 0x7c8   :  { %5019 = shalt.err (!%p5016_p9)
}
 0x7c9   :  { %3678 = dma.vmem_to_hbm [thread:$0]  %s3676_s28, 128, %s5400_s15, [#allocation4]  }
 0x7ca   :  { %5030 = dma.done.wait [#allocation4], 128  }
 0x7cb   :  { %5031 = vsyncadd [#allocation4], 4294967168 }
 0x7cc   :  { %3682 = vsyncpa [#allocation3], 1 }
 0x7cd   :  { %3683 = vsyncpa [#allocation6], 1 }
 0x7ce   :  { %3684 = vsyncpa [#allocation9], 1 }
 0x7cf   :  { %3685 = vsyncpa [#allocation12], 1 }
 0x7d0   :  { %3686 = vsyncpa [#allocation15], 1 }
 0x7d1   :  { %3687 = vsyncpa [#allocation4], 1 }

</bundles_post_ra>
